<compile_context>
chip_gen: v6e
topology: v6e:2x2x1
jax: 0.10.0
libtpu: 0.0.40
codegen_flags: <defaults>
</compile_context>

<pallas_src>
import jax
import jax.numpy as jnp
from jax.experimental import pallas as pl
from jax.experimental.pallas import tpu as pltpu

DIM = 7
C_DIM = DIM * 2
H_Q_DIM = 512
Z_DIM = 32

HEAD_PAD = 128      # fused mu||logvar head (2 * 32 = 64) zero-padded to 128 lanes
MAX_TB = 1024       # batch-tile cap (VMEM guard, esp. v7x 32 MiB scoped default)


def _round_up(n, m):
    return ((n + m - 1) // m) * m


def encoder_kernel(x_ref, c_ref, w1x_ref, w1c_ref, b1_ref, w2_ref, b2_ref,
                   wh_ref, bh_ref, out_ref):
    # Layer 1 with the concat fused away:
    #   h1 = [x | c] @ W1 + b1 = x @ W1[:7] + c @ W1[7:21] + b1   (f32)
    h1 = jnp.dot(x_ref[...], w1x_ref[...], preferred_element_type=jnp.float32)
    h1 = h1 + jnp.dot(c_ref[...], w1c_ref[...],
                      preferred_element_type=jnp.float32)
    h1 = jnp.maximum(h1 + b1_ref[...], 0.0)
    # TODO(synk): nn.Dropout(0.5) is identity in eval mode; training-time
    # random masking (pltpu.prng_* + scale by 2) is not implemented here.
    # Layer 2: (tb, 512) @ (512, 512) — bf16 operands, f32 accumulation.
    h2 = jnp.dot(h1.astype(jnp.bfloat16), w2_ref[...],
                 preferred_element_type=jnp.float32)
    h2 = jnp.maximum(h2 + b2_ref[...], 0.0)
    # Fused heads (f32): (tb, 512) @ (512, 128); cols [0:32)=mu, [32:64)=logvar.
    out = jnp.dot(h2, wh_ref[...], preferred_element_type=jnp.float32)
    out_ref[...] = (out + bh_ref[...]).astype(out_ref.dtype)


def prepare_kernel_params(params):
    """Split / fuse / cast the f32 params into the layout the kernel expects."""
    w1 = params["w1"].astype(jnp.float32)              # (21, 512)
    # fuse mu / logvar heads and pad to 128 output lanes (kept in f32).
    wh = jnp.zeros((H_Q_DIM, HEAD_PAD), jnp.float32)
    wh = wh.at[:, :Z_DIM].set(params["wmu"]).at[:, Z_DIM:2 * Z_DIM].set(params["wlv"])
    bh = jnp.zeros((1, HEAD_PAD), jnp.float32)
    bh = bh.at[:, :Z_DIM].set(params["bmu"]).at[:, Z_DIM:2 * Z_DIM].set(params["blv"])
    return dict(
        w1x=w1[:DIM],                                   # (7, 512)  f32
        w1c=w1[DIM:DIM + C_DIM],                        # (14, 512) f32
        b1=params["b1"].astype(jnp.float32),
        w2=params["w2"].astype(jnp.bfloat16),           # dominant weight -> bf16
        b2=params["b2"].astype(jnp.float32),
        wh=wh,
        bh=bh,
    )


def encoder_forward(x, c, kparams, *, batch_block=None):
    B = x.shape[0]

    # Auto tile: one grid step for small batches (single-TC v5e/v6e see zero
    # per-step overhead).  For large batches on v7x, pass batch_block so the
    # grid is an even multiple of 2 tiles (both TensorCores busy).
    if batch_block is None:
        tb = min(_round_up(B, 8), MAX_TB)
    else:
        tb = batch_block
    B_pad = _round_up(B, tb)

    x = x.astype(jnp.float32)
    c = c.astype(jnp.float32)
    if B_pad != B:
        x = jnp.pad(x, ((0, B_pad - B), (0, 0)))
        c = jnp.pad(c, ((0, B_pad - B), (0, 0)))

    grid = (B_pad // tb,)

    def resident(a):
        # small parameter resident for every grid step (constant index map
        # => no re-DMA across steps)
        return pl.BlockSpec(a.shape, lambda i: (0, 0))

    in_specs = [
        pl.BlockSpec((tb, DIM), lambda i: (i, 0)),
        pl.BlockSpec((tb, C_DIM), lambda i: (i, 0)),
        resident(kparams["w1x"]), resident(kparams["w1c"]), resident(kparams["b1"]),
        resident(kparams["w2"]), resident(kparams["b2"]),
        resident(kparams["wh"]), resident(kparams["bh"]),
    ]
    out_specs = pl.BlockSpec((tb, HEAD_PAD), lambda i: (i, 0))
    out_shape = jax.ShapeDtypeStruct((B_pad, HEAD_PAD), jnp.float32)

    flops = 2 * B_pad * ((DIM + C_DIM) * H_Q_DIM + H_Q_DIM * H_Q_DIM
                         + H_Q_DIM * HEAD_PAD)
    bytes_accessed = (
        int(x.size) * 4 + int(c.size) * 4
        + sum(int(v.size) * v.dtype.itemsize for v in kparams.values())
        + B_pad * HEAD_PAD * 4
    )

    out = pl.pallas_call(
        encoder_kernel,
        grid=grid,
        in_specs=in_specs,
        out_specs=out_specs,
        out_shape=out_shape,
        compiler_params=pltpu.CompilerParams(
            dimension_semantics=("parallel",)),
        cost_estimate=pl.CostEstimate(
            flops=flops, transcendentals=0, bytes_accessed=bytes_accessed),
    )(x, c, kparams["w1x"], kparams["w1c"], kparams["b1"],
      kparams["w2"], kparams["b2"], kparams["wh"], kparams["bh"])

    # TODO(synk): if the caller immediately computes reparameterization / KL,
    # fuse it here instead of slicing mu/logvar out in the wrapper.
    mu = out[:B, :Z_DIM]
    logvar = out[:B, Z_DIM:2 * Z_DIM]
    return mu, logvar


def init_params(key, input_dim, c_dim, h_q_dim, z_dim):
    """Deterministic init mimicking nn.Linear's U(-1/sqrt(fan_in), 1/sqrt(fan_in))."""
    def linear(k, fan_in, fan_out):
        k1, k2 = jax.random.split(k)
        bound = 1.0 / (fan_in ** 0.5)
        w = jax.random.uniform(k1, (fan_in, fan_out), jnp.float32, -bound, bound)
        b = jax.random.uniform(k2, (1, fan_out), jnp.float32, -bound, bound)
        return w, b

    ks = jax.random.split(key, 4)
    w1, b1 = linear(ks[0], input_dim + c_dim, h_q_dim)
    w2, b2 = linear(ks[1], h_q_dim, h_q_dim)
    wmu, bmu = linear(ks[2], h_q_dim, z_dim)
    wlv, blv = linear(ks[3], h_q_dim, z_dim)
    return dict(w1=w1, b1=b1, w2=w2, b2=b2,
                wmu=wmu, bmu=bmu, wlv=wlv, blv=blv)


def encoder_reference_f32(x, c, p):
    """Pure-JAX f32 reference = exact module semantics (dropout identity / eval)."""
    xc = jnp.concatenate([x, c], axis=1)
    h1 = jnp.maximum(xc @ p["w1"] + p["b1"], 0.0)
    h2 = jnp.maximum(h1 @ p["w2"] + p["b2"], 0.0)
    return h2 @ p["wmu"] + p["bmu"], h2 @ p["wlv"] + p["blv"]


def encoder_reference_kernel_precision(x, c, p):
    """Reference mirroring the kernel's numerics (bf16-rounded h1 and W2)."""
    xc = jnp.concatenate([x, c], axis=1)
    h1 = jnp.maximum(xc @ p["w1"] + p["b1"], 0.0)
    h1 = h1.astype(jnp.bfloat16).astype(jnp.float32)
    w2 = p["w2"].astype(jnp.bfloat16).astype(jnp.float32)
    h2 = jnp.maximum(h1 @ w2 + p["b2"], 0.0)
    return h2 @ p["wmu"] + p["bmu"], h2 @ p["wlv"] + p["blv"]


if __name__ == "__main__":
    key = jax.random.PRNGKey(0)
    kx, kc, kp = jax.random.split(key, 3)

    B = 64   # small, 8-aligned -> single grid step (no padding, no per-step overhead)
    x = jax.random.normal(kx, (B, DIM), jnp.float32)
    c = jax.random.normal(kc, (B, C_DIM), jnp.float32)
    params = init_params(kp, DIM, C_DIM, H_Q_DIM, Z_DIM)
    kparams = prepare_kernel_params(params)

    mu, logvar = encoder_forward(x, c, kparams)
    mu = jax.block_until_ready(mu)
    logvar = jax.block_until_ready(logvar)
    assert mu.shape == (B, Z_DIM) and logvar.shape == (B, Z_DIM)

    # Tight check vs. a reference that mirrors the kernel's numerics.
    mu_kp, logvar_kp = encoder_reference_kernel_precision(x, c, params)
    assert jnp.allclose(mu, mu_kp, atol=2e-3, rtol=2e-3)
    assert jnp.allclose(logvar, logvar_kp, atol=2e-3, rtol=2e-3)

    # Loose sanity check vs. the exact f32 module semantics (bf16 W2 delta).
    mu_f32, logvar_f32 = encoder_reference_f32(x, c, params)
    assert jnp.allclose(mu, mu_f32, atol=5e-2, rtol=5e-2)
    assert jnp.allclose(logvar, logvar_f32, atol=5e-2, rtol=5e-2)

    print("KERNEL_OK")
</pallas_src>

<mosaic_0001>
module attributes {stable_mosaic.version = 11 : i64} {
  func.func @encoder_kernel(%arg0: i32, %arg1: memref<64x7xf32, #tpu.memory_space<vmem>>, %arg2: memref<64x14xf32, #tpu.memory_space<vmem>>, %arg3: memref<7x512xf32, #tpu.memory_space<vmem>>, %arg4: memref<14x512xf32, #tpu.memory_space<vmem>>, %arg5: memref<1x512xf32, #tpu.memory_space<vmem>>, %arg6: memref<512x512xbf16, #tpu.memory_space<vmem>>, %arg7: memref<1x512xf32, #tpu.memory_space<vmem>>, %arg8: memref<512x128xf32, #tpu.memory_space<vmem>>, %arg9: memref<1x128xf32, #tpu.memory_space<vmem>>, %arg10: memref<64x128xf32, #tpu.memory_space<vmem>>) attributes {dimension_semantics = [#tpu.dimension_semantics<parallel>], iteration_bounds = array<i64: 1>, scalar_prefetch = 0 : i64, scratch_operands = 0 : i64, tpu.core_type = #tpu.core_type<tc>, window_params = [{transform_indices = @transform_0, window_bounds = array<i64: 64, 7>}, {transform_indices = @transform_1, window_bounds = array<i64: 64, 14>}, {pipeline_mode = #tpu.pipeline_mode<synchronous>, transform_indices = @transform_2, window_bounds = array<i64: 7, 512>}, {pipeline_mode = #tpu.pipeline_mode<synchronous>, transform_indices = @transform_3, window_bounds = array<i64: 14, 512>}, {pipeline_mode = #tpu.pipeline_mode<synchronous>, transform_indices = @transform_4, window_bounds = array<i64: 1, 512>}, {pipeline_mode = #tpu.pipeline_mode<synchronous>, transform_indices = @transform_5, window_bounds = array<i64: 512, 512>}, {pipeline_mode = #tpu.pipeline_mode<synchronous>, transform_indices = @transform_6, window_bounds = array<i64: 1, 512>}, {pipeline_mode = #tpu.pipeline_mode<synchronous>, transform_indices = @transform_7, window_bounds = array<i64: 512, 128>}, {pipeline_mode = #tpu.pipeline_mode<synchronous>, transform_indices = @transform_8, window_bounds = array<i64: 1, 128>}, {transform_indices = @transform_9, window_bounds = array<i64: 64, 128>}]} {
    %c0 = arith.constant 0 : index
    %c0_0 = arith.constant 0 : index
    %0 = vector.load %arg1[%c0, %c0_0] : memref<64x7xf32, #tpu.memory_space<vmem>>, vector<64x7xf32>
    %c0_1 = arith.constant 0 : index
    %c0_2 = arith.constant 0 : index
    %1 = vector.load %arg3[%c0_1, %c0_2] : memref<7x512xf32, #tpu.memory_space<vmem>>, vector<7x512xf32>
    %cst = arith.constant dense<0.000000e+00> : vector<64x512xf32>
    %2 = tpu.matmul %0, %1, %cst {dimension_numbers = #tpu.dot_dimension_numbers<[1], [0], [0], [1], [0, 0, 1, 1], [], []>} : vector<64x7xf32>, vector<7x512xf32>, vector<64x512xf32> -> vector<64x512xf32>
    %c0_3 = arith.constant 0 : index
    %c0_4 = arith.constant 0 : index
    %3 = vector.load %arg2[%c0_3, %c0_4] : memref<64x14xf32, #tpu.memory_space<vmem>>, vector<64x14xf32>
    %c0_5 = arith.constant 0 : index
    %c0_6 = arith.constant 0 : index
    %4 = vector.load %arg4[%c0_5, %c0_6] : memref<14x512xf32, #tpu.memory_space<vmem>>, vector<14x512xf32>
    %cst_7 = arith.constant dense<0.000000e+00> : vector<64x512xf32>
    %5 = tpu.matmul %3, %4, %cst_7 {dimension_numbers = #tpu.dot_dimension_numbers<[1], [0], [0], [1], [0, 0, 1, 1], [], []>} : vector<64x14xf32>, vector<14x512xf32>, vector<64x512xf32> -> vector<64x512xf32>
    %6 = arith.addf %2, %5 : vector<64x512xf32>
    %c0_8 = arith.constant 0 : index
    %c0_9 = arith.constant 0 : index
    %7 = vector.load %arg5[%c0_8, %c0_9] : memref<1x512xf32, #tpu.memory_space<vmem>>, vector<1x512xf32>
    %8 = vector.broadcast %7 : vector<1x512xf32> to vector<64x512xf32>
    %9 = arith.addf %6, %8 : vector<64x512xf32>
    %cst_10 = arith.constant 0.000000e+00 : f32
    %10 = vector.broadcast %cst_10 : f32 to vector<64x512xf32>
    %11 = arith.maximumf %9, %10 : vector<64x512xf32>
    %12 = arith.truncf %11 : vector<64x512xf32> to vector<64x512xbf16>
    %c0_11 = arith.constant 0 : index
    %c0_12 = arith.constant 0 : index
    %13 = vector.load %arg6[%c0_11, %c0_12] : memref<512x512xbf16, #tpu.memory_space<vmem>>, vector<512x512xbf16>
    %cst_13 = arith.constant dense<0.000000e+00> : vector<64x512xf32>
    %14 = tpu.matmul %12, %13, %cst_13 {dimension_numbers = #tpu.dot_dimension_numbers<[1], [0], [0], [1], [0, 0, 1, 1], [], []>} : vector<64x512xbf16>, vector<512x512xbf16>, vector<64x512xf32> -> vector<64x512xf32>
    %c0_14 = arith.constant 0 : index
    %c0_15 = arith.constant 0 : index
    %15 = vector.load %arg7[%c0_14, %c0_15] : memref<1x512xf32, #tpu.memory_space<vmem>>, vector<1x512xf32>
    %16 = vector.broadcast %15 : vector<1x512xf32> to vector<64x512xf32>
    %17 = arith.addf %14, %16 : vector<64x512xf32>
    %cst_16 = arith.constant 0.000000e+00 : f32
    %18 = vector.broadcast %cst_16 : f32 to vector<64x512xf32>
    %19 = arith.maximumf %17, %18 : vector<64x512xf32>
    %c0_17 = arith.constant 0 : index
    %c0_18 = arith.constant 0 : index
    %20 = vector.load %arg8[%c0_17, %c0_18] : memref<512x128xf32, #tpu.memory_space<vmem>>, vector<512x128xf32>
    %cst_19 = arith.constant dense<0.000000e+00> : vector<64x128xf32>
    %21 = tpu.matmul %19, %20, %cst_19 {dimension_numbers = #tpu.dot_dimension_numbers<[1], [0], [0], [1], [0, 0, 1, 1], [], []>} : vector<64x512xf32>, vector<512x128xf32>, vector<64x128xf32> -> vector<64x128xf32>
    %c0_20 = arith.constant 0 : index
    %c0_21 = arith.constant 0 : index
    %22 = vector.load %arg9[%c0_20, %c0_21] : memref<1x128xf32, #tpu.memory_space<vmem>>, vector<1x128xf32>
    %23 = vector.broadcast %22 : vector<1x128xf32> to vector<64x128xf32>
    %24 = arith.addf %21, %23 : vector<64x128xf32>
    %c0_22 = arith.constant 0 : index
    %c0_23 = arith.constant 0 : index
    %25 = vector.load %arg10[%c0_22, %c0_23] : memref<64x128xf32, #tpu.memory_space<vmem>>, vector<64x128xf32>
    tpu.vector_store %arg10[%c0_22, %c0_23], %24 {strides = array<i32>} : memref<64x128xf32, #tpu.memory_space<vmem>>, vector<64x128xf32>,
    return
  }
  func.func @transform_0(%arg0: i32) -> (i32, i32) {
    %c0_i32 = arith.constant 0 : i32
    %c0_i32_0 = arith.constant 0 : i32
    return %arg0, %c0_i32 : i32, i32
  }
  func.func @transform_1(%arg0: i32) -> (i32, i32) {
    %c0_i32 = arith.constant 0 : i32
    %c0_i32_0 = arith.constant 0 : i32
    return %arg0, %c0_i32 : i32, i32
  }
  func.func @transform_2(%arg0: i32) -> (i32, i32) {
    %c0_i32 = arith.constant 0 : i32
    %c0_i32_0 = arith.constant 0 : i32
    %c0_i32_1 = arith.constant 0 : i32
    return %c0_i32, %c0_i32_0 : i32, i32
  }
  func.func @transform_3(%arg0: i32) -> (i32, i32) {
    %c0_i32 = arith.constant 0 : i32
    %c0_i32_0 = arith.constant 0 : i32
    %c0_i32_1 = arith.constant 0 : i32
    return %c0_i32, %c0_i32_0 : i32, i32
  }
  func.func @transform_4(%arg0: i32) -> (i32, i32) {
    %c0_i32 = arith.constant 0 : i32
    %c0_i32_0 = arith.constant 0 : i32
    %c0_i32_1 = arith.constant 0 : i32
    return %c0_i32, %c0_i32_0 : i32, i32
  }
  func.func @transform_5(%arg0: i32) -> (i32, i32) {
    %c0_i32 = arith.constant 0 : i32
    %c0_i32_0 = arith.constant 0 : i32
    %c0_i32_1 = arith.constant 0 : i32
    return %c0_i32, %c0_i32_0 : i32, i32
  }
  func.func @transform_6(%arg0: i32) -> (i32, i32) {
    %c0_i32 = arith.constant 0 : i32
    %c0_i32_0 = arith.constant 0 : i32
    %c0_i32_1 = arith.constant 0 : i32
    return %c0_i32, %c0_i32_0 : i32, i32
  }
  func.func @transform_7(%arg0: i32) -> (i32, i32) {
    %c0_i32 = arith.constant 0 : i32
    %c0_i32_0 = arith.constant 0 : i32
    %c0_i32_1 = arith.constant 0 : i32
    return %c0_i32, %c0_i32_0 : i32, i32
  }
  func.func @transform_8(%arg0: i32) -> (i32, i32) {
    %c0_i32 = arith.constant 0 : i32
    %c0_i32_0 = arith.constant 0 : i32
    %c0_i32_1 = arith.constant 0 : i32
    return %c0_i32, %c0_i32_0 : i32, i32
  }
  func.func @transform_9(%arg0: i32) -> (i32, i32) {
    %c0_i32 = arith.constant 0 : i32
    %c0_i32_0 = arith.constant 0 : i32
    return %arg0, %c0_i32 : i32, i32
  }
}

</mosaic_0001>

<bundles_post_ra>
// kernel: tpu_custom_call.1
= control target key start
LH: loop header
LB: loop body
LE: loop exit
PB: predicated region body
PF: predicated region fallthrough
CT: control target
= control target key end

     0   :  { %14 = vsyncpa [#allocation3], 0  ;;  %s3161_s0 = inlined_call_operand.vmem [shape: f32[64,7], index: 0, kind: input, shape index: {}]   ;;  %s3162_s1 = inlined_call_operand.vmem [shape: f32[64,14], index: 1, kind: input, shape index: {}]   ;;  %s3163_s2 = inlined_call_operand.vmem [shape: f32[7,512], index: 2, kind: input, shape index: {}]   ;;  %s3164_s3 = inlined_call_operand.vmem [shape: f32[14,512], index: 3, kind: input, shape index: {}]   ;;  %s3165_s4 = inlined_call_operand.vmem [shape: f32[1,512], index: 4, kind: input, shape index: {}]   ;;  %s3166_s5 = inlined_call_operand.hbm [shape: bf16[512,512], index: 5, kind: input, shape index: {}]   ;;  %s3167_s6 = inlined_call_operand.vmem [shape: f32[1,512], index: 6, kind: input, shape index: {}]   ;;  %s3168_s7 = inlined_call_operand.hbm [shape: f32[512,128], index: 7, kind: input, shape index: {}]   ;;  %s3169_s8 = inlined_call_operand.vmem [shape: f32[1,128], index: 8, kind: input, shape index: {}]   ;;  %s3170_s9 = inlined_call_operand.hbm [shape: f32[64,128], index: 9, kind: output, shape index: {}]  }
   0x1   :  { %15 = vsyncpa [#allocation6], 0 }
   0x2   :  { %16 = vsyncpa [#allocation4], 0  ;;  %s2687_s30 = smov [#allocation2]  }
   0x3   :  { %s32_s10 = sshll.u32 %s2687_s30, 4  ;;  %s33_s10 = int_to_ptr.vmem [resolvable:$true] %s32_s10 }
   0x4   :  { %s2629_s11 = scalar_lea.vmem %s33_s10, 16384  ;;  %p2634_p1 = scmp.lt.s32.totalorder %s33_s10, %s33_s10 }
   0x5   :  { %p2630_p0 = scmp.ne.s32.totalorder %s33_s10, %s2629_s11  ;;  %p2635_p2 = scmp.lt.s32.totalorder %s2629_s11, %s2629_s11 }
   0x7   :  { %p2636_p3 = por %p2635_p2, %p2634_p1 }
   0x9   :  { %p2637_p4 = pnand %p2636_p3, %p2630_p0 }
   0xb   :  { %2640 = shalt.err (!%p2637_p4)
}
   0xc   :  { %s2688_s12 = smov 256   ;;  %s2689_s13 = smov 16  }
   0xd   :  { %38 = dma.hbm_to_vmem [thread:$0]  %s3166_s5, 16384, %s33_s10, [#allocation3], %s2688_s12, %s2688_s12, %s2689_s13  }
   0xe   :  { %s2690_s16 = smov [#allocation5]  }
   0xf   :  { %s46_s17 = sshll.u32 %s2690_s16, 4  ;;  %s47_s17 = int_to_ptr.vmem [resolvable:$true] %s46_s17 }
  0x10   :  { %s2649_s18 = scalar_lea.vmem %s47_s17, 8192  ;;  %p2654_p6 = scmp.lt.s32.totalorder %s47_s17, %s47_s17 }
  0x11   :  { %p2650_p5 = scmp.ne.s32.totalorder %s47_s17, %s2649_s18  ;;  %p2655_p7 = scmp.lt.s32.totalorder %s2649_s18, %s2649_s18 }
  0x13   :  { %p2656_p8 = por %p2655_p7, %p2654_p6 }
  0x15   :  { %p2657_p9 = pnand %p2656_p8, %p2650_p5 }
  0x17   :  { %2660 = shalt.err (!%p2657_p9)
}
  0x18   :  { %s2691_s19 = smov 128   ;;  %s2692_s20 = smov 8  }
  0x19   :  { %52 = dma.hbm_to_vmem [thread:$0]  %s3168_s7, 8192, %s47_s17, [#allocation6], %s2691_s19, %s2691_s19, %s2692_s20  }
  0x1a   :  { %2681 = dma.done.wait [#allocation3], 16384  }
  0x1b   :  { %2682 = vsyncadd [#allocation3], 4294950912 }
  0x1c   :  { %2683 = dma.done.wait [#allocation6], 8192  }
  0x1d   :  { %2684 = vsyncadd [#allocation6], 4294959104  ;;  %v2693_v0 = vmov 0.0   ;;  %vm114_vm0 = vcmask 1045504   ;;  %v86_v1 = vld [vmem:[%s3164_s3 + $0x28] sm:$0x3f] }
  0x1e   :  { %191 = vmatprep.mubr.f32.mxu0 %v2693_v0  ;;  %304 = vmatprep.mubr.f32.mxu1 %v2693_v0  ;;  %v88_v2 = vld [vmem:[%s3164_s3 + $0x38] sm:$0x3f]  ;;  %v85_v3 = vld [vmem:[%s3164_s3 + $0x20] sm:$0x3f]  ;;  %v87_v4 = vld [vmem:[%s3164_s3 + $0x30] sm:$0x3f] }
  0x1f   :  { %2140 = vmatprep.subr.msk.mxu0 %vm114_vm0, %v86_v1  ;;  %2150 = vmatprep.subr.msk.mxu1 %vm114_vm0, %v88_v2  ;;  %v82_v5 = vld [vmem:[%s3164_s3 + $0x8] sm:$0xff]  ;;  %v84_v6 = vld [vmem:[%s3164_s3 + $0x18] sm:$0xff]  ;;  %v81_v7 = vld [vmem:[%s3164_s3] sm:$0xff]  ;;  %vm89_vm1 = vcmask 113664   ;;  %vm378_vm2 = vcmask 1046528   ;;  %vm353_vm3 = vcmask 56320  }
  0x20   :  { %2141 = vmatpush1.msk.msra.mxu0 %vm114_vm0, %v85_v3  ;;  %2151 = vmatpush1.msk.msra.mxu1 %vm114_vm0, %v87_v4  ;;  %v83_v8 = vld [vmem:[%s3164_s3 + $0x10] sm:$0xff]  ;;  %v73_v9 = vld [vmem:[%s3162_s1] sm:$0xff]  ;;  %v70_v10 = vld [vmem:[%s3163_s2 + $0x8] sm:$0x7f] }
  0x21   :  { %157 = vmatprep.subr.mxu0 %v82_v5  ;;  %270 = vmatprep.subr.mxu1 %v84_v6  ;;  %v72_v11 = vld [vmem:[%s3163_s2 + $0x18] sm:$0x7f]  ;;  %v69_v12 = vld [vmem:[%s3163_s2] sm:$0x7f]  ;;  %v71_v13 = vld [vmem:[%s3163_s2 + $0x10] sm:$0x7f] }
  0x22   :  { %158 = vmatpush1.msra.mxu0 %v81_v7  ;;  %271 = vmatpush1.msra.mxu1 %v83_v8  ;;  %v74_v14 = vld [vmem:[%s3162_s1 + $0x8] sm:$0xff]  ;;  %v75_v15 = vld [vmem:[%s3162_s1 + $0x10] sm:$0xff]  ;;  %v76_v18 = vld [vmem:[%s3162_s1 + $0x18] sm:$0xff] }
  0x23   :  { %2142 = vmatmul.mubr.msk.f32.vlgmr.msra.gmra.mxu0 %vm89_vm1, %v73_v9  ;;  %2152 = vmatmul.mubr.msk.f32.vlgmr.msra.gmra.mxu1 %vm89_vm1, %v73_v9  ;;  %v2431_v16 = vld [vmem:[#allocation2 + $0xe4] ss:$16 sps:$4 sm:$0xff]   ;;  %v78_v20 = vld [vmem:[%s3162_s1 + $0x28] sm:$0xff]  ;;  %v80_v22 = vld [vmem:[%s3162_s1 + $0x38] sm:$0xff] }
  0x24   :  { %2160 = vmatprep.subr.msk.mxu0 %vm378_vm2, %v70_v10  ;;  %2170 = vmatprep.subr.msk.mxu1 %vm378_vm2, %v72_v11  ;;  %v2434_v17 = vld [vmem:[#allocation2 + $0x2e4] ss:$16 sps:$4 sm:$0xff]   ;;  %v2429_v24 = vld [vmem:[#allocation2 + $0xe0] ss:$16 sps:$4 sm:$0xff]   ;;  %v62_v28 = vld [vmem:[%s3161_s0 + $0x8] sm:$0xff] }
  0x25   :  { %2161 = vmatpush1.msk.msra.mxu0 %vm378_vm2, %v69_v12  ;;  %197 = vmatprep.mubr.f32.mxu0 %v2693_v0  ;;  %v77_v19 = vld [vmem:[%s3162_s1 + $0x20] sm:$0xff]  ;;  %v79_v21 = vld [vmem:[%s3162_s1 + $0x30] sm:$0xff]  ;;  %v64_v38 = vld [vmem:[%s3161_s0 + $0x18] sm:$0xff] }
  0x26   :  { %310 = vmatprep.mubr.f32.mxu1 %v2693_v0  ;;  %2171 = vmatpush1.msk.msra.mxu1 %vm378_vm2, %v71_v13  ;;  %v61_v23 = vld [vmem:[%s3161_s0] sm:$0xff]  ;;  %v63_v33 = vld [vmem:[%s3161_s0 + $0x10] sm:$0xff]  ;;  %v66_v46 = vld [vmem:[%s3161_s0 + $0x28] sm:$0xff] }
  0x27   :  { %2143 = vmatmul.mubr.msk.f32.gmra.mxu0 %vm89_vm1, %v74_v14  ;;  %2153 = vmatmul.mubr.msk.f32.gmra.mxu1 %vm89_vm1, %v74_v14  ;;  %v2432_v25 = vld [vmem:[#allocation2 + $0x2e0] ss:$16 sps:$4 sm:$0xff]   ;;  %v2437_v26 = vld [vmem:[#allocation2 + $0xc4] ss:$16 sps:$4 sm:$0xff]   ;;  %v68_v48 = vld [vmem:[%s3161_s0 + $0x38] sm:$0xff] }
  0x28   :  { %203 = vmatprep.mubr.f32.mxu0 %v2693_v0  ;;  %316 = vmatprep.mubr.f32.mxu1 %v2693_v0  ;;  %v2440_v27 = vld [vmem:[#allocation2 + $0x2c4] ss:$16 sps:$4 sm:$0xff]   ;;  %v2435_v29 = vld [vmem:[#allocation2 + $0xc0] ss:$16 sps:$4 sm:$0xff]  }
  0x29   :  { %1509 = vmatprep.subr.bf16.mxu0 %v2431_v16  ;;  %1582 = vmatprep.subr.bf16.mxu1 %v2434_v17  ;;  %v2438_v30 = vld [vmem:[#allocation2 + $0x2c0] ss:$16 sps:$4 sm:$0xff]   ;;  %v2443_v31 = vld [vmem:[#allocation2 + $0xa4] ss:$16 sps:$4 sm:$0xff]  }
  0x2a   :  { %v2446_v32 = vld [vmem:[#allocation2 + $0x2a4] ss:$16 sps:$4 sm:$0xff]   ;;  %v2441_v34 = vld [vmem:[#allocation2 + $0xa0] ss:$16 sps:$4 sm:$0xff]  }
  0x2b   :  { %2144 = vmatmul.mubr.msk.f32.gmra.mxu0 %vm89_vm1, %v75_v15  ;;  %2154 = vmatmul.mubr.msk.f32.gmra.mxu1 %vm89_vm1, %v75_v15  ;;  %v2444_v35 = vld [vmem:[#allocation2 + $0x2a0] ss:$16 sps:$4 sm:$0xff]   ;;  %v2449_v36 = vld [vmem:[#allocation2 + $0x84] ss:$16 sps:$4 sm:$0xff]  }
  0x2c   :  { %209 = vmatprep.mubr.f32.mxu0 %v2693_v0  ;;  %322 = vmatprep.mubr.f32.mxu1 %v2693_v0  ;;  %v2452_v37 = vld [vmem:[#allocation2 + $0x284] ss:$16 sps:$4 sm:$0xff]   ;;  %v2447_v39 = vld [vmem:[#allocation2 + $0x80] ss:$16 sps:$4 sm:$0xff]  }
  0x2d   :  { %v2450_v40 = vld [vmem:[#allocation2 + $0x280] ss:$16 sps:$4 sm:$0xff]   ;;  %v2455_v41 = vld [vmem:[#allocation2 + $0x64] ss:$16 sps:$4 sm:$0xff]  }
  0x2e   :  { %v2458_v42 = vld [vmem:[#allocation2 + $0x264] ss:$16 sps:$4 sm:$0xff]   ;;  %v2453_v44 = vld [vmem:[#allocation2 + $0x60] ss:$16 sps:$4 sm:$0xff]  }
  0x2f   :  { %2145 = vmatmul.mubr.msk.f32.gmra.mxu0 %vm89_vm1, %v76_v18  ;;  %2155 = vmatmul.mubr.msk.f32.gmra.mxu1 %vm89_vm1, %v76_v18  ;;  %v65_v43 = vld [vmem:[%s3161_s0 + $0x20] sm:$0xff]  ;;  %v67_v47 = vld [vmem:[%s3161_s0 + $0x30] sm:$0xff] }
  0x30   :  { %215 = vmatprep.mubr.f32.mxu0 %v2693_v0  ;;  %328 = vmatprep.mubr.f32.mxu1 %v2693_v0  ;;  %v2456_v45 = vld [vmem:[#allocation2 + $0x260] ss:$16 sps:$4 sm:$0xff]   ;;  %v2461_v49 = vld [vmem:[#allocation2 + $0x44] ss:$16 sps:$4 sm:$0xff]  }
  0x31   :  { %v2464_v50 = vld [vmem:[#allocation2 + $0x244] ss:$16 sps:$4 sm:$0xff]   ;;  %v2459_v51 = vld [vmem:[#allocation2 + $0x40] ss:$16 sps:$4 sm:$0xff]  }
  0x32   :  { %v2462_v52 = vld [vmem:[#allocation2 + $0x240] ss:$16 sps:$4 sm:$0xff]   ;;  %v2467_v53 = vld [vmem:[#allocation2 + $0x24] ss:$16 sps:$4 sm:$0xff]  }
  0x33   :  { %2146 = vmatmul.mubr.msk.f32.gmra.mxu0 %vm89_vm1, %v77_v19  ;;  %2156 = vmatmul.mubr.msk.f32.gmra.mxu1 %vm89_vm1, %v77_v19  ;;  %v2470_v54 = vld [vmem:[#allocation2 + $0x224] ss:$16 sps:$4 sm:$0xff]   ;;  %v2465_v55 = vld [vmem:[#allocation2 + $0x20] ss:$16 sps:$4 sm:$0xff]  }
  0x34   :  { %221 = vmatprep.mubr.f32.mxu0 %v2693_v0  ;;  %334 = vmatprep.mubr.f32.mxu1 %v2693_v0  ;;  %v2468_v56 = vld [vmem:[#allocation2 + $0x220] ss:$16 sps:$4 sm:$0xff]   ;;  %v2473_v57 = vld [vmem:[#allocation2 + $0x4] ss:$16 sps:$4 sm:$0xff]  }
  0x35   :  { %v2476_v58 = vld [vmem:[#allocation2 + $0x204] ss:$16 sps:$4 sm:$0xff]   ;;  %v2471_v59 = vld [vmem:[#allocation2] ss:$16 sps:$4 sm:$0xff]  }
  0x36   :  { %v2474_v60 = vld [vmem:[#allocation2 + $0x200] ss:$16 sps:$4 sm:$0xff]   ;;  %v2479_v61 = vld [vmem:[#allocation2 + $0x1e4] ss:$16 sps:$4 sm:$0xff]  }
  0x37   :  { %2147 = vmatmul.mubr.msk.f32.gmra.mxu0 %vm89_vm1, %v78_v20  ;;  %2157 = vmatmul.mubr.msk.f32.gmra.mxu1 %vm89_vm1, %v78_v20  ;;  %v2482_v62 = vld [vmem:[#allocation2 + $0x3e4] ss:$16 sps:$4 sm:$0xff]   ;;  %v2477_v63 = vld [vmem:[#allocation2 + $0x1e0] ss:$16 sps:$4 sm:$0xff]  }
  0x38   :  { %227 = vmatprep.mubr.f32.mxu0 %v2693_v0  ;;  %340 = vmatprep.mubr.f32.mxu1 %v2693_v0  ;;  %v2485_v1 = vld [vmem:[#allocation2 + $0x1c4] ss:$16 sps:$4 sm:$0xff]   ;;  %v2483_v3 = vld [vmem:[#allocation2 + $0x1c0] ss:$16 sps:$4 sm:$0xff]  }
  0x39   :  { %v2488_v2 = vld [vmem:[#allocation2 + $0x3c4] ss:$16 sps:$4 sm:$0xff]   ;;  %v2486_v4 = vld [vmem:[#allocation2 + $0x3c0] ss:$16 sps:$4 sm:$0xff]  }
  0x3a   :  { %v2491_v5 = vld [vmem:[#allocation2 + $0x1a4] ss:$16 sps:$4 sm:$0xff]   ;;  %v2489_v7 = vld [vmem:[#allocation2 + $0x1a0] ss:$16 sps:$4 sm:$0xff]  }
  0x3b   :  { %2148 = vmatmul.mubr.msk.f32.gmra.mxu0 %vm89_vm1, %v79_v21  ;;  %2158 = vmatmul.mubr.msk.f32.gmra.mxu1 %vm89_vm1, %v79_v21  ;;  %v2494_v6 = vld [vmem:[#allocation2 + $0x3a4] ss:$16 sps:$4 sm:$0xff]   ;;  %v2492_v8 = vld [vmem:[#allocation2 + $0x3a0] ss:$16 sps:$4 sm:$0xff]  }
  0x3c   :  { %233 = vmatprep.mubr.f32.mxu0 %v2693_v0  ;;  %346 = vmatprep.mubr.f32.mxu1 %v2693_v0  ;;  %v2497_v9 = vld [vmem:[#allocation2 + $0x184] ss:$16 sps:$4 sm:$0xff]   ;;  %v2495_v11 = vld [vmem:[#allocation2 + $0x180] ss:$16 sps:$4 sm:$0xff]  }
  0x3d   :  { %v2500_v10 = vld [vmem:[#allocation2 + $0x384] ss:$16 sps:$4 sm:$0xff]   ;;  %v2498_v12 = vld [vmem:[#allocation2 + $0x380] ss:$16 sps:$4 sm:$0xff]  }
  0x3e   :  { %v2503_v13 = vld [vmem:[#allocation2 + $0x164] ss:$16 sps:$4 sm:$0xff]   ;;  %v2501_v15 = vld [vmem:[#allocation2 + $0x160] ss:$16 sps:$4 sm:$0xff]  }
  0x3f   :  { %2149 = vmatmul.mubr.msk.f32.gmra.mxu0 %vm89_vm1, %v80_v22  ;;  %2159 = vmatmul.mubr.msk.f32.gmra.mxu1 %vm89_vm1, %v80_v22  ;;  %v2506_v14 = vld [vmem:[#allocation2 + $0x364] ss:$16 sps:$4 sm:$0xff]   ;;  %v2504_v16 = vld [vmem:[#allocation2 + $0x360] ss:$16 sps:$4 sm:$0xff]  }
  0x40   :  { %455 = vmatprep.mubr.f32.mxu0 %v2693_v0  ;;  %568 = vmatprep.mubr.f32.mxu1 %v2693_v0  ;;  %v2509_v17 = vld [vmem:[#allocation2 + $0x144] ss:$16 sps:$4 sm:$0xff]   ;;  %v2507_v19 = vld [vmem:[#allocation2 + $0x140] ss:$16 sps:$4 sm:$0xff]  }
  0x41   :  { %v2512_v18 = vld [vmem:[#allocation2 + $0x344] ss:$16 sps:$4 sm:$0xff]   ;;  %v2510_v20 = vld [vmem:[#allocation2 + $0x340] ss:$16 sps:$4 sm:$0xff]  }
  0x42   :  { %v2515_v21 = vld [vmem:[#allocation2 + $0x124] ss:$16 sps:$4 sm:$0xff]  }
  0x43   :  { %2162 = vmatmul.mubr.msk.f32.vlgmr.msra.gmra.mxu0 %vm353_vm3, %v61_v23  ;;  %2172 = vmatmul.mubr.msk.f32.vlgmr.msra.gmra.mxu1 %vm353_vm3, %v61_v23  ;;  %v2518_v22 = vld [vmem:[#allocation2 + $0x324] ss:$16 sps:$4 sm:$0xff]   ;;  %v2513_v23 = vld [vmem:[#allocation2 + $0x120] ss:$16 sps:$4 sm:$0xff]  }
  0x44   :  { %461 = vmatprep.mubr.f32.mxu0 %v2693_v0  ;;  %574 = vmatprep.mubr.f32.mxu1 %v2693_v0 }
  0x45   :  { %1510 = vmatpush1.bf16.msra.mxu0 %v2429_v24  ;;  %1583 = vmatpush1.bf16.msra.mxu1 %v2432_v25  ;;  %v2516_v24 = vld [vmem:[#allocation2 + $0x320] ss:$16 sps:$4 sm:$0xff]   ;;  %v2521_v25 = vld [vmem:[#allocation2 + $0x104] ss:$16 sps:$4 sm:$0xff]  }
  0x46   :  { %1511 = vmatprep.subr.bf16.mxu0 %v2437_v26  ;;  %1584 = vmatprep.subr.bf16.mxu1 %v2440_v27  ;;  %v2524_v26 = vld [vmem:[#allocation2 + $0x304] ss:$16 sps:$4 sm:$0xff]   ;;  %v2519_v27 = vld [vmem:[#allocation2 + $0x100] ss:$16 sps:$4 sm:$0xff]  }
  0x47   :  { %2163 = vmatmul.mubr.msk.f32.gmra.mxu0 %vm353_vm3, %v62_v28  ;;  %2173 = vmatmul.mubr.msk.f32.gmra.mxu1 %vm353_vm3, %v62_v28  ;;  %v2522_v28 = vld [vmem:[#allocation2 + $0x300] ss:$16 sps:$4 sm:$0xff]  }
  0x48   :  { %467 = vmatprep.mubr.f32.mxu0 %v2693_v0  ;;  %580 = vmatprep.mubr.f32.mxu1 %v2693_v0 }
  0x49   :  { %1512 = vmatpush1.bf16.msra.mxu0 %v2435_v29  ;;  %1585 = vmatpush1.bf16.msra.mxu1 %v2438_v30  ;;  %v2527_v29 = vld [vmem:[#allocation2 + $0xec] ss:$16 sps:$4 sm:$0xff]  }
  0x4a   :  { %1513 = vmatprep.subr.bf16.mxu0 %v2443_v31  ;;  %1586 = vmatprep.subr.bf16.mxu1 %v2446_v32  ;;  %v2530_v30 = vld [vmem:[#allocation2 + $0x2ec] ss:$16 sps:$4 sm:$0xff]  }
  0x4b   :  { %2164 = vmatmul.mubr.msk.f32.gmra.mxu0 %vm353_vm3, %v63_v33  ;;  %2174 = vmatmul.mubr.msk.f32.gmra.mxu1 %vm353_vm3, %v63_v33 }
  0x4c   :  { %473 = vmatprep.mubr.f32.mxu0 %v2693_v0  ;;  %586 = vmatprep.mubr.f32.mxu1 %v2693_v0 }
  0x4d   :  { %1514 = vmatpush1.bf16.msra.mxu0 %v2441_v34  ;;  %1587 = vmatpush1.bf16.msra.mxu1 %v2444_v35 }
  0x4e   :  { %1515 = vmatprep.subr.bf16.mxu0 %v2449_v36  ;;  %1588 = vmatprep.subr.bf16.mxu1 %v2452_v37 }
  0x4f   :  { %2165 = vmatmul.mubr.msk.f32.gmra.mxu0 %vm353_vm3, %v64_v38  ;;  %2175 = vmatmul.mubr.msk.f32.gmra.mxu1 %vm353_vm3, %v64_v38 }
  0x50   :  { %479 = vmatprep.mubr.f32.mxu0 %v2693_v0  ;;  %592 = vmatprep.mubr.f32.mxu1 %v2693_v0 }
  0x51   :  { %1516 = vmatpush1.bf16.msra.mxu0 %v2447_v39  ;;  %1589 = vmatpush1.bf16.msra.mxu1 %v2450_v40 }
  0x52   :  { %1517 = vmatprep.subr.bf16.mxu0 %v2455_v41  ;;  %1590 = vmatprep.subr.bf16.mxu1 %v2458_v42 }
  0x53   :  { %2166 = vmatmul.mubr.msk.f32.gmra.mxu0 %vm353_vm3, %v65_v43  ;;  %2176 = vmatmul.mubr.msk.f32.gmra.mxu1 %vm353_vm3, %v65_v43 }
  0x54   :  { %485 = vmatprep.mubr.f32.mxu0 %v2693_v0  ;;  %598 = vmatprep.mubr.f32.mxu1 %v2693_v0 }
  0x55   :  { %1518 = vmatpush1.bf16.msra.mxu0 %v2453_v44  ;;  %1591 = vmatpush1.bf16.msra.mxu1 %v2456_v45 }
  0x56   :  { %1519 = vmatprep.subr.bf16.mxu0 %v2461_v49  ;;  %1592 = vmatprep.subr.bf16.mxu1 %v2464_v50 }
  0x57   :  { %2167 = vmatmul.mubr.msk.f32.gmra.mxu0 %vm353_vm3, %v66_v46  ;;  %2177 = vmatmul.mubr.msk.f32.gmra.mxu1 %vm353_vm3, %v66_v46 }
  0x58   :  { %491 = vmatprep.mubr.f32.mxu0 %v2693_v0  ;;  %604 = vmatprep.mubr.f32.mxu1 %v2693_v0 }
  0x59   :  { %1520 = vmatpush1.bf16.msra.mxu0 %v2459_v51  ;;  %1593 = vmatpush1.bf16.msra.mxu1 %v2462_v52 }
  0x5a   :  { %1521 = vmatprep.subr.bf16.mxu0 %v2467_v53  ;;  %1594 = vmatprep.subr.bf16.mxu1 %v2470_v54 }
  0x5b   :  { %2168 = vmatmul.mubr.msk.f32.gmra.mxu0 %vm353_vm3, %v67_v47  ;;  %2178 = vmatmul.mubr.msk.f32.gmra.mxu1 %vm353_vm3, %v67_v47 }
  0x5c   :  { %497 = vmatprep.mubr.f32.mxu0 %v2693_v0  ;;  %610 = vmatprep.mubr.f32.mxu1 %v2693_v0  ;;  %v2480_v0 = vld [vmem:[#allocation2 + $0x3e0] ss:$16 sps:$4 sm:$0xff]  }
  0x5d   :  { %1522 = vmatpush1.bf16.msra.mxu0 %v2465_v55  ;;  %1595 = vmatpush1.bf16.msra.mxu1 %v2468_v56  ;;  %v619_v55 = vlaneseq }
  0x5e   :  { %1523 = vmatprep.subr.bf16.mxu0 %v2473_v57  ;;  %1596 = vmatprep.subr.bf16.mxu1 %v2476_v58 }
  0x5f   :  { %2169 = vmatmul.mubr.msk.f32.gmra.mxu0 %vm353_vm3, %v68_v48  ;;  %2179 = vmatmul.mubr.msk.f32.gmra.mxu1 %vm353_vm3, %v68_v48 }
  0x61   :  { %1524 = vmatpush1.bf16.msra.mxu0 %v2471_v59  ;;  %1597 = vmatpush1.bf16.msra.mxu1 %v2474_v60  ;;  %v2940_v60 = vshrl.u32 %v619_v55, 7 }
  0x62   :  { %1525 = vmatprep.subr.bf16.mxu0 %v2479_v61  ;;  %1598 = vmatprep.subr.bf16.mxu1 %v2482_v62 }
  0x65   :  { %1526 = vmatpush2.bf16.msra.mxu0 %v2477_v63  ;;  %1599 = vmatpush2.bf16.msra.mxu1 %v2480_v0 }
  0x66   :  { %1527 = vmatprep.subr.bf16.mxu0 %v2485_v1  ;;  %1600 = vmatprep.subr.bf16.mxu1 %v2488_v2  ;;  %v621_v1 = vsub.s32 0, %v2940_v60  ;;  %v617_v2 = vld [vmem:[%s3165_s4] sm:$0xf] }
  0x69   :  { %1528 = vmatpush2.bf16.msra.mxu0 %v2483_v3  ;;  %1601 = vmatpush2.bf16.msra.mxu1 %v2486_v4  ;;  %v629_v3 = vsub.s32 2, %v2940_v60  ;;  %v625_v4 = vsub.s32 1, %v2940_v60 }
  0x6a   :  { %1529 = vmatprep.subr.bf16.mxu0 %v2491_v5  ;;  %1602 = vmatprep.subr.bf16.mxu1 %v2494_v6 }
  0x6d   :  { %1530 = vmatpush2.bf16.msra.mxu0 %v2489_v7  ;;  %1603 = vmatpush2.bf16.msra.mxu1 %v2492_v8  ;;  %v633_v7 = vsub.s32 3, %v2940_v60 }
  0x6e   :  { %1531 = vmatprep.subr.bf16.mxu0 %v2497_v9  ;;  %1604 = vmatprep.subr.bf16.mxu1 %v2500_v10  ;;  %v2959_v9 = vrot.slane %v617_v2, %v621_v1 }
  0x71   :  { %1532 = vmatpush2.bf16.msra.mxu0 %v2495_v11  ;;  %1605 = vmatpush2.bf16.msra.mxu1 %v2498_v12 }
  0x72   :  { %1533 = vmatprep.subr.bf16.mxu0 %v2503_v13  ;;  %1606 = vmatprep.subr.bf16.mxu1 %v2506_v14  ;;  %v2963_v13 = vrot.slane %v617_v2, %v629_v3 }
  0x75   :  { %1534 = vmatpush2.bf16.msra.mxu0 %v2501_v15  ;;  %1607 = vmatpush2.bf16.msra.mxu1 %v2504_v16  ;;  %v2967_v15 = vrot.slane %v617_v2, %v625_v4 }
  0x76   :  { %1535 = vmatprep.subr.bf16.mxu0 %v2509_v17  ;;  %1608 = vmatprep.subr.bf16.mxu1 %v2512_v18  ;;  %v2971_v17 = vrot.slane %v617_v2, %v633_v7 }
  0x79   :  { %1536 = vmatpush2.bf16.msra.mxu0 %v2507_v19  ;;  %1609 = vmatpush2.bf16.msra.mxu1 %v2510_v20 }
  0x7a   :  { %1537 = vmatprep.subr.bf16.mxu0 %v2515_v21  ;;  %1610 = vmatprep.subr.bf16.mxu1 %v2518_v22 }
  0x7d   :  { %1538 = vmatpush2.bf16.msra.mxu0 %v2513_v23  ;;  %1611 = vmatpush2.bf16.msra.mxu1 %v2516_v24 }
  0x7e   :  { %1539 = vmatprep.subr.bf16.mxu0 %v2521_v25  ;;  %1612 = vmatprep.subr.bf16.mxu1 %v2524_v26 }
  0x81   :  { %1540 = vmatpush2.bf16.msra.mxu0 %v2519_v27  ;;  %1613 = vmatpush2.bf16.msra.mxu1 %v2522_v28 }
  0x82   :  { %1655 = vmatprep.subr.bf16.mxu0 %v2527_v29  ;;  %1728 = vmatprep.subr.bf16.mxu1 %v2530_v30 }
  0xe3   :  { %v193_v31 = vpop.f32.mrf.mxu0  ;;  %v306_v32 = vpop.f32.mrf.mxu1 }
  0xe5   :  { %v195_v33 = vpop.f32.mrf.mxu0  ;;  %v308_v34 = vpop.f32.mrf.mxu1 }
  0xe7   :  { %v199_v35 = vpop.f32.mrf.mxu0  ;;  %v312_v36 = vpop.f32.mrf.mxu1 }
  0xe9   :  { %v201_v37 = vpop.f32.mrf.mxu0  ;;  %v314_v38 = vpop.f32.mrf.mxu1 }
  0xeb   :  { %v205_v39 = vpop.f32.mrf.mxu0  ;;  %v2902_v40 = vpop.f32.mrf.mxu1 }
  0xed   :  { %v2904_v41 = vpop.f32.mrf.mxu0  ;;  %v2906_v42 = vpop.f32.mrf.mxu1 }
  0xef   :  { %v2908_v43 = vpop.f32.mrf.mxu0  ;;  %v2910_v44 = vpop.f32.mrf.mxu1 }
  0xf1   :  { %v2912_v45 = vpop.f32.mrf.mxu0  ;;  %v2914_v46 = vpop.f32.mrf.mxu1 }
  0xf3   :  { %v2916_v47 = vpop.f32.mrf.mxu0  ;;  %v2918_v48 = vpop.f32.mrf.mxu1 }
  0xf5   :  { %v2920_v49 = vpop.f32.mrf.mxu0  ;;  %v2922_v50 = vpop.f32.mrf.mxu1 }
  0xf7   :  { %v2924_v51 = vpop.f32.mrf.mxu0  ;;  %v2926_v52 = vpop.f32.mrf.mxu1 }
  0xf9   :  { %v2928_v53 = vpop.f32.mrf.mxu0  ;;  %v2930_v54 = vpop.f32.mrf.mxu1 }
  0xfb   :  { %v2932_v56 = vpop.f32.mrf.mxu0  ;;  %v2934_v57 = vpop.f32.mrf.mxu1 }
  0xfd   :  { %v2936_v58 = vpop.f32.mrf.mxu0  ;;  %v2938_v59 = vpop.f32.mrf.mxu1 }
  0xff   :  { %v2942_v61 = vpop.f32.mrf.mxu0  ;;  %v2944_v62 = vpop.f32.mrf.mxu1 }
 0x101   :  { %v2946_v63 = vpop.f32.mrf.mxu0  ;;  %v2948_v0 = vpop.f32.mrf.mxu1 }
 0x103   :  { %v457_v5 = vpop.f32.mrf.mxu0  ;;  %v570_v6 = vpop.f32.mrf.mxu1 }
 0x104   :  { %v458_v8 = vadd.f32 %v457_v5, %v193_v31  ;;  %v571_v12 = vadd.f32 %v570_v6, %v306_v32 }
 0x105   :  { %v459_v10 = vpop.f32.mrf.mxu0  ;;  %v572_v11 = vpop.f32.mrf.mxu1 }
 0x106   :  { %v460_v14 = vadd.f32 %v459_v10, %v195_v33  ;;  %v573_v16 = vadd.f32 %v572_v11, %v308_v34  ;;  %v639_v20 = vadd.f32 %v2959_v9, %v458_v8  ;;  %v641_v25 = vadd.f32 %v2963_v13, %v571_v12 }
 0x107   :  { %v463_v18 = vpop.f32.mrf.mxu0  ;;  %v576_v19 = vpop.f32.mrf.mxu1 }
 0x108   :  { %v464_v21 = vadd.f32 %v463_v18, %v199_v35  ;;  %v577_v22 = vadd.f32 %v576_v19, %v312_v36  ;;  %v640_v26 = vadd.f32 %v2967_v15, %v460_v14  ;;  %v642_v29 = vadd.f32 %v2971_v17, %v573_v16 }
 0x109   :  { %v465_v23 = vpop.f32.mrf.mxu0  ;;  %v578_v24 = vpop.f32.mrf.mxu1  ;;  %v671_v55 = vmax.f32 %v639_v20, 0.0 }
 0x10a   :  { %v466_v27 = vadd.f32 %v465_v23, %v201_v37  ;;  %v579_v28 = vadd.f32 %v578_v24, %v314_v38  ;;  %v643_v30 = vadd.f32 %v2959_v9, %v464_v21  ;;  %v645_v31 = vadd.f32 %v2963_v13, %v577_v22 }
 0x10b   :  { %v469_v32 = vpop.f32.mrf.mxu0  ;;  %v582_v33 = vpop.f32.mrf.mxu1  ;;  %v673_v37 = vmax.f32 %v641_v25, 0.0  ;;  %v672_v38 = vmax.f32 %v640_v26, 0.0  ;;  %v674_v12 = vmax.f32 %v642_v29, 0.0 }
 0x10c   :  { %v644_v34 = vadd.f32 %v2967_v15, %v466_v27  ;;  %v646_v35 = vadd.f32 %v2971_v17, %v579_v28  ;;  %v470_v36 = vadd.f32 %v469_v32, %v205_v39  ;;  %v675_v2 = vmax.f32 %v643_v30, 0.0  ;;  %v2528_v27 = vld [vmem:[#allocation2 + $0x2e8] ss:$16 sps:$4 sm:$0xff]   ;;  %v2533_v30 = vld [vmem:[#allocation2 + $0xcc] ss:$16 sps:$4 sm:$0xff]  }
 0x10d   :  { %v677_v5 = vmax.f32 %v645_v31, 0.0  ;;  %v471_v6 = vpop.f32.mrf.mxu0  ;;  %v584_v8 = vpop.f32.mrf.mxu1  ;;  %v583_v14 = vadd.f32 %v582_v33, %v2902_v40  ;;  %v2536_v31 = vld [vmem:[#allocation2 + $0x2cc] ss:$16 sps:$4 sm:$0xff]  }
 0x10e   :  { %v676_v10 = vmax.f32 %v644_v34, 0.0  ;;  %v678_v11 = vmax.f32 %v646_v35, 0.0  ;;  %v472_v16 = vadd.f32 %v471_v6, %v2904_v41  ;;  %v585_v18 = vadd.f32 %v584_v8, %v2906_v42  ;;  %v2525_v42 = vld [vmem:[#allocation2 + $0xe8] ss:$16 sps:$4 sm:$0xff]  }
 0x10f   :  { %v475_v19 = vpop.f32.mrf.mxu0  ;;  %v588_v21 = vpop.f32.mrf.mxu1  ;;  %v2985_v39 = vadd.f32 %v2959_v9, %v470_v36  ;;  %v2989_v23 = vpack.c.bf16 %v675_v2, %v671_v55  ;;  %v2991_v24 = vpack.c.bf16 %v677_v5, %v673_v37  ;;  %v649_v32 = vadd.f32 %v2963_v13, %v583_v14  ;;  %v2534_v37 = vld [vmem:[#allocation2 + $0x2c8] ss:$16 sps:$4 sm:$0xff]  }
 0x110   :  { %v476_v20 = vadd.f32 %v475_v19, %v2908_v43  ;;  %v589_v22 = vadd.f32 %v588_v21, %v2910_v44  ;;  %v2993_v40 = vpack.c.bf16 %v676_v10, %v672_v38  ;;  %v2995_v41 = vpack.c.bf16 %v678_v11, %v674_v12  ;;  %v2539_v38 = vld [vmem:[#allocation2 + $0xac] ss:$16 sps:$4 sm:$0xff]  }
 0x111   :  { %v477_v25 = vpop.f32.mrf.mxu0  ;;  %v590_v26 = vpop.f32.mrf.mxu1  ;;  %v648_v33 = vadd.f32 %v2967_v15, %v472_v16  ;;  %v650_v34 = vadd.f32 %v2971_v17, %v585_v18  ;;  %v679_v2 = vmax.f32 %v2985_v39, 0.0  ;;  %v2542_v16 = vld [vmem:[#allocation2 + $0x2ac] ss:$16 sps:$4 sm:$0xff]   ;;  %v681_v18 = vmax.f32 %v649_v32, 0.0 }
 0x112   :  { %v651_v28 = vadd.f32 %v2959_v9, %v476_v20  ;;  %v653_v29 = vadd.f32 %v2963_v13, %v589_v22  ;;  %v478_v43 = vadd.f32 %v477_v25, %v2912_v45  ;;  %v591_v44 = vadd.f32 %v590_v26, %v2914_v46  ;;  %1541 = vmatprep.mubr.bf16.mxu0 %v2993_v40  ;;  %v2531_v46 = vld [vmem:[#allocation2 + $0xc8] ss:$16 sps:$4 sm:$0xff]  }
 0x113   :  { %1614 = vmatprep.mubr.bf16.mxu1 %v2995_v41  ;;  %v481_v35 = vpop.f32.mrf.mxu0  ;;  %v594_v36 = vpop.f32.mrf.mxu1  ;;  %1542 = vmatmul.mubr.bf16.vlgmr.msra.gmra.mxu0 %v2989_v23  ;;  %v680_v19 = vmax.f32 %v648_v33, 0.0  ;;  %v682_v21 = vmax.f32 %v650_v34, 0.0 }
 0x114   :  { %v652_v55 = vadd.f32 %v2967_v15, %v478_v43  ;;  %v654_v45 = vadd.f32 %v2971_v17, %v591_v44  ;;  %1615 = vmatmul.mubr.bf16.vlgmr.msra.gmra.mxu1 %v2991_v24  ;;  %v482_v5 = vadd.f32 %v481_v35, %v2916_v47  ;;  %1656 = vmatpush1.bf16.msra.mxu0 %v2525_v42  ;;  %v683_v10 = vmax.f32 %v651_v28, 0.0 }
 0x115   :  { %1729 = vmatpush1.bf16.msra.mxu1 %v2528_v27  ;;  %v483_v6 = vpop.f32.mrf.mxu0  ;;  %v596_v8 = vpop.f32.mrf.mxu1  ;;  %v685_v11 = vmax.f32 %v653_v29, 0.0  ;;  %1657 = vmatprep.subr.bf16.mxu0 %v2533_v30  ;;  %v595_v22 = vadd.f32 %v594_v36, %v2918_v48  ;;  %v2540_v30 = vld [vmem:[#allocation2 + $0x2a8] ss:$16 sps:$4 sm:$0xff]   ;;  %v2548_v36 = vld [vmem:[#allocation2 + $0x28c] ss:$16 sps:$4 sm:$0xff]  }
 0x116   :  { %v684_v12 = vmax.f32 %v652_v55, 0.0  ;;  %v686_v14 = vmax.f32 %v654_v45, 0.0  ;;  %1730 = vmatprep.subr.bf16.mxu1 %v2536_v31  ;;  %v484_v39 = vadd.f32 %v483_v6, %v2920_v49  ;;  %v597_v25 = vadd.f32 %v596_v8, %v2922_v50  ;;  %v2537_v49 = vld [vmem:[#allocation2 + $0xa8] ss:$16 sps:$4 sm:$0xff]  }
 0x117   :  { %v487_v20 = vpop.f32.mrf.mxu0  ;;  %v600_v47 = vpop.f32.mrf.mxu1  ;;  %v655_v27 = vadd.f32 %v2959_v9, %v482_v5  ;;  %v3023_v50 = vpack.c.bf16 %v683_v10, %v679_v2  ;;  %v2543_v6 = vld [vmem:[#allocation2 + $0x88] ss:$16 sps:$4 sm:$0xff]  }
 0x118   :  { %v488_v26 = vadd.f32 %v487_v20, %v2924_v51  ;;  %v601_v42 = vadd.f32 %v600_v47, %v2926_v52  ;;  %1658 = vmatpush1.bf16.msra.mxu0 %v2531_v46  ;;  %v3018_v43 = vpack.c.bf16 %v684_v12, %v680_v19  ;;  %v3020_v44 = vpack.c.bf16 %v686_v14, %v682_v21  ;;  %v2545_v52 = vld [vmem:[#allocation2 + $0x8c] ss:$16 sps:$4 sm:$0xff]   ;;  %v2546_v8 = vld [vmem:[#allocation2 + $0x288] ss:$16 sps:$4 sm:$0xff]  }
 0x119   :  { %1731 = vmatpush1.bf16.msra.mxu1 %v2534_v37  ;;  %v489_v28 = vpop.f32.mrf.mxu0  ;;  %v602_v29 = vpop.f32.mrf.mxu1  ;;  %1659 = vmatprep.subr.bf16.mxu0 %v2539_v38  ;;  %v3025_v51 = vpack.c.bf16 %v685_v11, %v681_v18  ;;  %v656_v31 = vadd.f32 %v2967_v15, %v484_v39  ;;  %v658_v46 = vadd.f32 %v2971_v17, %v597_v25  ;;  %v687_v37 = vmax.f32 %v655_v27, 0.0  ;;  %v2551_v12 = vld [vmem:[#allocation2 + $0x6c] ss:$16 sps:$4 sm:$0xff]  }
 0x11a   :  { %v659_v48 = vadd.f32 %v2959_v9, %v488_v26  ;;  %1732 = vmatprep.subr.bf16.mxu1 %v2542_v16  ;;  %v490_v32 = vadd.f32 %v489_v28, %v2928_v53  ;;  %v603_v33 = vadd.f32 %v602_v29, %v2930_v54  ;;  %1551 = vmatprep.mubr.bf16.mxu0 %v3018_v43  ;;  %v2554_v14 = vld [vmem:[#allocation2 + $0x26c] ss:$16 sps:$4 sm:$0xff]   ;;  %v2549_v29 = vld [vmem:[#allocation2 + $0x68] ss:$16 sps:$4 sm:$0xff]  }
 0x11b   :  { %1624 = vmatprep.mubr.bf16.mxu1 %v3020_v44  ;;  %v493_v34 = vpop.f32.mrf.mxu0  ;;  %v606_v35 = vpop.f32.mrf.mxu1  ;;  %v661_v45 = vadd.f32 %v2963_v13, %v601_v42  ;;  %1552 = vmatmul.mubr.bf16.gmra.mxu0 %v3023_v50  ;;  %v657_v38 = vadd.f32 %v2963_v13, %v595_v22  ;;  %v688_v16 = vmax.f32 %v656_v31, 0.0 }
 0x11c   :  { %v691_v55 = vmax.f32 %v659_v48, 0.0  ;;  %1625 = vmatmul.mubr.bf16.gmra.mxu1 %v3025_v51  ;;  %v660_v53 = vadd.f32 %v2967_v15, %v490_v32  ;;  %v662_v54 = vadd.f32 %v2971_v17, %v603_v33  ;;  %1660 = vmatpush1.bf16.msra.mxu0 %v2537_v49  ;;  %v494_v21 = vadd.f32 %v493_v34, %v2932_v56  ;;  %v2552_v32 = vld [vmem:[#allocation2 + $0x268] ss:$16 sps:$4 sm:$0xff]  }
 0x11d   :  { %1733 = vmatpush1.bf16.msra.mxu1 %v2540_v30  ;;  %v495_v2 = vpop.f32.mrf.mxu0  ;;  %v608_v5 = vpop.f32.mrf.mxu1  ;;  %1661 = vmatprep.subr.bf16.mxu0 %v2545_v52  ;;  %v693_v47 = vmax.f32 %v661_v45, 0.0  ;;  %v607_v25 = vadd.f32 %v606_v35, %v2934_v57  ;;  %v689_v49 = vmax.f32 %v657_v38, 0.0  ;;  %v2557_v52 = vld [vmem:[#allocation2 + $0x4c] ss:$16 sps:$4 sm:$0xff]  }
 0x11e   :  { %v496_v10 = vadd.f32 %v495_v2, %v2936_v58  ;;  %v609_v11 = vadd.f32 %v608_v5, %v2938_v59  ;;  %v692_v18 = vmax.f32 %v660_v53, 0.0  ;;  %v694_v19 = vmax.f32 %v662_v54, 0.0  ;;  %1734 = vmatprep.subr.bf16.mxu1 %v2548_v36  ;;  %v2560_v35 = vld [vmem:[#allocation2 + $0x24c] ss:$16 sps:$4 sm:$0xff]  }
 0x11f   :  { %v499_v39 = vpop.f32.mrf.mxu0  ;;  %v612_v20 = vpop.f32.mrf.mxu1  ;;  %v3044_v26 = vpack.c.bf16 %v691_v55, %v687_v37  ;;  %v690_v58 = vmax.f32 %v658_v46, 0.0  ;;  %v665_v36 = vadd.f32 %v2963_v13, %v607_v25  ;;  %v2561_v37 = vld [vmem:[#allocation2 + $0x28] ss:$16 sps:$4 sm:$0xff]  }
 0x120   :  { %v664_v22 = vadd.f32 %v2967_v15, %v496_v10  ;;  %v500_v59 = vadd.f32 %v499_v39, %v2942_v61  ;;  %v613_v42 = vadd.f32 %v612_v20, %v2944_v62  ;;  %1662 = vmatpush1.bf16.msra.mxu0 %v2543_v6  ;;  %v3048_v56 = vpack.c.bf16 %v692_v18, %v688_v16  ;;  %v2572_v16 = vld [vmem:[#allocation2 + $0x20c] ss:$16 sps:$4 sm:$0xff]   ;;  %v2567_v18 = vld [vmem:[#allocation2 + $0x8] ss:$16 sps:$4 sm:$0xff]  }
 0x121   :  { %1735 = vmatpush1.bf16.msra.mxu1 %v2546_v8  ;;  %v501_v27 = vpop.f32.mrf.mxu0  ;;  %v614_v28 = vpop.f32.mrf.mxu1  ;;  %v666_v30 = vadd.f32 %v2971_v17, %v609_v11  ;;  %1663 = vmatprep.subr.bf16.mxu0 %v2551_v12  ;;  %v663_v61 = vadd.f32 %v2959_v9, %v494_v21  ;;  %v3056_v31 = vpack.c.bf16 %v694_v19, %v690_v58  ;;  %v2566_v8 = vld [vmem:[#allocation2 + $0x22c] ss:$16 sps:$4 sm:$0xff]   ;;  %v697_v38 = vmax.f32 %v665_v36, 0.0  ;;  %v2564_v12 = vld [vmem:[#allocation2 + $0x228] ss:$16 sps:$4 sm:$0xff]  }
 0x122   :  { %v502_v57 = vadd.f32 %v501_v27, %v2946_v63  ;;  %v615_v48 = vadd.f32 %v614_v28, %v2948_v0  ;;  %1736 = vmatprep.subr.bf16.mxu1 %v2554_v14  ;;  %v667_v62 = vadd.f32 %v2959_v9, %v500_v59  ;;  %1561 = vmatprep.mubr.bf16.mxu0 %v3048_v56  ;;  %v696_v55 = vmax.f32 %v664_v22, 0.0  ;;  %v2555_v9 = vld [vmem:[#allocation2 + $0x48] ss:$16 sps:$4 sm:$0xff]   ;;  %v2569_v11 = vld [vmem:[#allocation2 + $0xc] ss:$16 sps:$4 sm:$0xff]  }
 0x123   :  { %v669_v33 = vadd.f32 %v2963_v13, %v613_v42  ;;  %1562 = vmatmul.mubr.bf16.gmra.mxu0 %v3044_v26  ;;  %v3062_v0 = vpack.c.bf16 %v693_v47, %v689_v49  ;;  %1634 = vmatprep.mubr.bf16.mxu1 %v3056_v31  ;;  %v698_v45 = vmax.f32 %v666_v30, 0.0  ;;  %v695_v2 = vmax.f32 %v663_v61, 0.0  ;;  %v2575_v19 = vld [vmem:[#allocation2 + $0x1ec] ss:$16 sps:$4 sm:$0xff]   ;;  %v2570_v21 = vld [vmem:[#allocation2 + $0x208] ss:$16 sps:$4 sm:$0xff]  }
 0x124   :  { %v668_v34 = vadd.f32 %v2967_v15, %v502_v57  ;;  %v670_v63 = vadd.f32 %v2971_v17, %v615_v48  ;;  %1664 = vmatpush1.bf16.msra.mxu0 %v2549_v29  ;;  %v699_v46 = vmax.f32 %v667_v62, 0.0  ;;  %v2558_v15 = vld [vmem:[#allocation2 + $0x248] ss:$16 sps:$4 sm:$0xff]   ;;  %v2563_v17 = vld [vmem:[#allocation2 + $0x2c] ss:$16 sps:$4 sm:$0xff]  }
 0x125   :  { %1635 = vmatmul.mubr.bf16.gmra.mxu1 %v3062_v0  ;;  %1665 = vmatprep.subr.bf16.mxu0 %v2557_v52  ;;  %v701_v5 = vmax.f32 %v669_v33, 0.0  ;;  %v2578_v39 = vld [vmem:[#allocation2 + $0x3ec] ss:$16 sps:$4 sm:$0xff]   ;;  %v2573_v20 = vld [vmem:[#allocation2 + $0x1e8] ss:$16 sps:$4 sm:$0xff]  }
 0x126   :  { %v700_v53 = vmax.f32 %v668_v34, 0.0  ;;  %v702_v54 = vmax.f32 %v670_v63, 0.0  ;;  %1737 = vmatpush1.bf16.msra.mxu1 %v2552_v32  ;;  %v3073_v10 = vpack.c.bf16 %v699_v46, %v695_v2  ;;  %v2581_v47 = vld [vmem:[#allocation2 + $0x1cc] ss:$16 sps:$4 sm:$0xff]   ;;  %v2576_v25 = vld [vmem:[#allocation2 + $0x3e8] ss:$16 sps:$4 sm:$0xff]  }
 0x127   :  { %1738 = vmatprep.subr.bf16.mxu1 %v2560_v35  ;;  %v3076_v14 = vpack.c.bf16 %v701_v5, %v697_v38  ;;  %v2584_v22 = vld [vmem:[#allocation2 + $0x3cc] ss:$16 sps:$4 sm:$0xff]   ;;  %v2582_v59 = vld [vmem:[#allocation2 + $0x3c8] ss:$16 sps:$4 sm:$0xff]   ;;  %v1847_v2 = vld [vmem:[#allocation5 + $0x70] sm:$0xff] }
 0x128   :  { %v3067_v6 = vpack.c.bf16 %v700_v53, %v696_v55  ;;  %v3069_v13 = vpack.c.bf16 %v702_v54, %v698_v45  ;;  %1666 = vmatpush1.bf16.msra.mxu0 %v2555_v9  ;;  %v2587_v58 = vld [vmem:[#allocation2 + $0x1ac] ss:$16 sps:$4 sm:$0xff]   ;;  %v2588_v28 = vld [vmem:[#allocation2 + $0x3a8] ss:$16 sps:$4 sm:$0xff]   ;;  %v1845_v38 = vld [vmem:[#allocation5 + $0x60] sm:$0xff] }
 0x129   :  { %1667 = vmatprep.subr.bf16.mxu0 %v2563_v17  ;;  %v2590_v42 = vld [vmem:[#allocation2 + $0x3ac] ss:$16 sps:$4 sm:$0xff]   ;;  %v2591_v49 = vld [vmem:[#allocation2 + $0x188] ss:$16 sps:$4 sm:$0xff]   ;;  %v1863_v17 = vld [vmem:[#allocation5 + $0xf0] sm:$0xff] }
 0x12a   :  { %1571 = vmatprep.mubr.bf16.mxu0 %v3067_v6  ;;  %1644 = vmatprep.mubr.bf16.mxu1 %v3069_v13  ;;  %v2593_v27 = vld [vmem:[#allocation2 + $0x18c] ss:$16 sps:$4 sm:$0xff]   ;;  %v2594_v57 = vld [vmem:[#allocation2 + $0x388] ss:$16 sps:$4 sm:$0xff]  }
 0x12b   :  { %1739 = vmatpush1.bf16.msra.mxu1 %v2558_v15  ;;  %1572 = vmatmul.mubr.bf16.gmra.mxu0 %v3073_v10  ;;  %v2596_v29 = vld [vmem:[#allocation2 + $0x38c] ss:$16 sps:$4 sm:$0xff]   ;;  %v2597_v52 = vld [vmem:[#allocation2 + $0x168] ss:$16 sps:$4 sm:$0xff]  }
 0x12c   :  { %1740 = vmatprep.subr.bf16.mxu1 %v2566_v8  ;;  %1668 = vmatpush1.bf16.msra.mxu0 %v2561_v37  ;;  %v2599_v30 = vld [vmem:[#allocation2 + $0x16c] ss:$16 sps:$4 sm:$0xff]   ;;  %v2600_v62 = vld [vmem:[#allocation2 + $0x368] ss:$16 sps:$4 sm:$0xff]   ;;  %v1861_v37 = vld [vmem:[#allocation5 + $0xe0] sm:$0xff] }
 0x12d   :  { %1687 = vmatprep.mubr.bf16.mxu0 %v2993_v40  ;;  %1645 = vmatmul.mubr.bf16.gmra.mxu1 %v3076_v14  ;;  %v2579_v40 = vld [vmem:[#allocation2 + $0x1c8] ss:$16 sps:$4 sm:$0xff]   ;;  %v2602_v48 = vld [vmem:[#allocation2 + $0x36c] ss:$16 sps:$4 sm:$0xff]  }
 0x12e   :  { %1669 = vmatprep.subr.bf16.mxu0 %v2569_v11  ;;  %1760 = vmatprep.mubr.bf16.mxu1 %v2995_v41  ;;  %v2585_v41 = vld [vmem:[#allocation2 + $0x1a8] ss:$16 sps:$4 sm:$0xff]   ;;  %v2605_v61 = vld [vmem:[#allocation2 + $0x14c] ss:$16 sps:$4 sm:$0xff]  }
 0x12f   :  { %1741 = vmatpush1.bf16.msra.mxu1 %v2564_v12  ;;  %v2608_v32 = vld [vmem:[#allocation2 + $0x34c] ss:$16 sps:$4 sm:$0xff]   ;;  %v2603_v33 = vld [vmem:[#allocation2 + $0x148] ss:$16 sps:$4 sm:$0xff]  }
 0x130   :  { %1742 = vmatprep.subr.bf16.mxu1 %v2572_v16  ;;  %1670 = vmatpush1.bf16.msra.mxu0 %v2567_v18  ;;  %v2611_v34 = vld [vmem:[#allocation2 + $0x12c] ss:$16 sps:$4 sm:$0xff]   ;;  %v2606_v63 = vld [vmem:[#allocation2 + $0x348] ss:$16 sps:$4 sm:$0xff]   ;;  %v1857_v16 = vld [vmem:[#allocation5 + $0xc0] sm:$0xff] }
 0x131   :  { %1671 = vmatprep.subr.bf16.mxu0 %v2575_v19  ;;  %v2614_v35 = vld [vmem:[#allocation2 + $0x32c] ss:$16 sps:$4 sm:$0xff]   ;;  %v2609_v36 = vld [vmem:[#allocation2 + $0x128] ss:$16 sps:$4 sm:$0xff]   ;;  %v1841_v18 = vld [vmem:[#allocation5 + $0x40] sm:$0xff] }
 0x132   :  { %v2617_v55 = vld [vmem:[#allocation2 + $0x10c] ss:$16 sps:$4 sm:$0xff]   ;;  %v2612_v9 = vld [vmem:[#allocation2 + $0x328] ss:$16 sps:$4 sm:$0xff]  }
 0x133   :  { %1743 = vmatpush1.bf16.msra.mxu1 %v2570_v21  ;;  %v2620_v45 = vld [vmem:[#allocation2 + $0x30c] ss:$16 sps:$4 sm:$0xff]   ;;  %v2615_v46 = vld [vmem:[#allocation2 + $0x108] ss:$16 sps:$4 sm:$0xff]   ;;  %v1855_v21 = vld [vmem:[#allocation5 + $0xb0] sm:$0xff] }
 0x134   :  { %1744 = vmatprep.subr.bf16.mxu1 %v2578_v39  ;;  %1672 = vmatpush2.bf16.msra.mxu0 %v2573_v20  ;;  %v2618_v53 = vld [vmem:[#allocation2 + $0x308] ss:$16 sps:$4 sm:$0xff]   ;;  %v1853_v39 = vld [vmem:[#allocation5 + $0xa0] sm:$0xff] }
 0x135   :  { %1673 = vmatprep.subr.bf16.mxu0 %v2581_v47  ;;  %v1864_v54 = vld [vmem:[#allocation5 + $0xf8] sm:$0xff]  ;;  %v1862_v5 = vld [vmem:[#allocation5 + $0xe8] sm:$0xff]  ;;  %v1837_v20 = vld [vmem:[#allocation5 + $0x20] sm:$0xff] }
 0x136   :  { %v1848_v15 = vld [vmem:[#allocation5 + $0x78] sm:$0xff]  ;;  %v1846_v8 = vld [vmem:[#allocation5 + $0x68] sm:$0xff] }
 0x137   :  { %1745 = vmatpush2.bf16.msra.mxu1 %v2576_v25  ;;  %v1860_v11 = vld [vmem:[#allocation5 + $0xd8] sm:$0xff]  ;;  %v1851_v25 = vld [vmem:[#allocation5 + $0x90] sm:$0xff] }
 0x138   :  { %1746 = vmatprep.subr.bf16.mxu1 %v2584_v22  ;;  %1674 = vmatpush2.bf16.msra.mxu0 %v2579_v40  ;;  %v1844_v12 = vld [vmem:[#allocation5 + $0x58] sm:$0xff]  ;;  %v1849_v22 = vld [vmem:[#allocation5 + $0x80] sm:$0xff] }
 0x139   :  { %1675 = vmatprep.subr.bf16.mxu0 %v2587_v58  ;;  %v1856_v19 = vld [vmem:[#allocation5 + $0xb8] sm:$0xff]  ;;  %v1833_v40 = vld [vmem:[#allocation5] sm:$0xff] }
 0x13a   :  { %v1852_v47 = vld [vmem:[#allocation5 + $0x98] sm:$0xff] }
 0x13b   :  { %1747 = vmatpush2.bf16.msra.mxu1 %v2582_v59  ;;  %v1896_v58 = vld [vmem:[#allocation5 + $0x1f8] sm:$0xff] }
 0x13c   :  { %1748 = vmatprep.subr.bf16.mxu1 %v2590_v42  ;;  %1676 = vmatpush2.bf16.msra.mxu0 %v2585_v41  ;;  %v1880_v59 = vld [vmem:[#allocation5 + $0x178] sm:$0xff]  ;;  %v1895_v42 = vld [vmem:[#allocation5 + $0x1f0] sm:$0xff]  ;;  %v1894_v41 = vld [vmem:[#allocation5 + $0x1e8] sm:$0xff] }
 0x13d   :  { %1677 = vmatprep.subr.bf16.mxu0 %v2593_v27  ;;  %v1878_v27 = vld [vmem:[#allocation5 + $0x168] sm:$0xff] }
 0x13f   :  { %1749 = vmatpush2.bf16.msra.mxu1 %v2588_v28  ;;  %v1877_v28 = vld [vmem:[#allocation5 + $0x160] sm:$0xff] }
 0x140   :  { %1750 = vmatprep.subr.bf16.mxu1 %v2596_v29  ;;  %1678 = vmatpush2.bf16.msra.mxu0 %v2591_v49  ;;  %v1892_v29 = vld [vmem:[#allocation5 + $0x1d8] sm:$0xff] }
 0x141   :  { %1679 = vmatprep.subr.bf16.mxu0 %v2599_v30  ;;  %v1876_v49 = vld [vmem:[#allocation5 + $0x158] sm:$0xff]  ;;  %v1891_v30 = vld [vmem:[#allocation5 + $0x1d0] sm:$0xff] }
 0x143   :  { %1751 = vmatpush2.bf16.msra.mxu1 %v2594_v57  ;;  %v1875_v57 = vld [vmem:[#allocation5 + $0x150] sm:$0xff] }
 0x144   :  { %1752 = vmatprep.subr.bf16.mxu1 %v2602_v48  ;;  %1680 = vmatpush2.bf16.msra.mxu0 %v2597_v52  ;;  %v1890_v48 = vld [vmem:[#allocation5 + $0x1c8] sm:$0xff] }
 0x145   :  { %1681 = vmatprep.subr.bf16.mxu0 %v2605_v61  ;;  %v1874_v52 = vld [vmem:[#allocation5 + $0x148] sm:$0xff]  ;;  %v1889_v61 = vld [vmem:[#allocation5 + $0x1c0] sm:$0xff] }
 0x147   :  { %1753 = vmatpush2.bf16.msra.mxu1 %v2600_v62  ;;  %v1873_v62 = vld [vmem:[#allocation5 + $0x140] sm:$0xff] }
 0x148   :  { %1754 = vmatprep.subr.bf16.mxu1 %v2608_v32  ;;  %1682 = vmatpush2.bf16.msra.mxu0 %v2603_v33  ;;  %v1888_v32 = vld [vmem:[#allocation5 + $0x1b8] sm:$0xff] }
 0x149   :  { %1683 = vmatprep.subr.bf16.mxu0 %v2611_v34  ;;  %v1872_v33 = vld [vmem:[#allocation5 + $0x138] sm:$0xff]  ;;  %v1887_v34 = vld [vmem:[#allocation5 + $0x1b0] sm:$0xff] }
 0x14b   :  { %1755 = vmatpush2.bf16.msra.mxu1 %v2606_v63  ;;  %v1871_v63 = vld [vmem:[#allocation5 + $0x130] sm:$0xff] }
 0x14c   :  { %1756 = vmatprep.subr.bf16.mxu1 %v2614_v35  ;;  %1684 = vmatpush2.bf16.msra.mxu0 %v2609_v36  ;;  %v1886_v35 = vld [vmem:[#allocation5 + $0x1a8] sm:$0xff] }
 0x14d   :  { %1685 = vmatprep.subr.bf16.mxu0 %v2617_v55  ;;  %v1870_v36 = vld [vmem:[#allocation5 + $0x128] sm:$0xff]  ;;  %v1885_v55 = vld [vmem:[#allocation5 + $0x1a0] sm:$0xff] }
 0x14f   :  { %1757 = vmatpush2.bf16.msra.mxu1 %v2612_v9  ;;  %v1869_v9 = vld [vmem:[#allocation5 + $0x120] sm:$0xff] }
 0x150   :  { %1758 = vmatprep.subr.bf16.mxu1 %v2620_v45  ;;  %1686 = vmatpush2.bf16.msra.mxu0 %v2615_v46  ;;  %v1884_v45 = vld [vmem:[#allocation5 + $0x198] sm:$0xff] }
 0x151   :  { %2309 = vmatprep.subr.mxu0 %v1864_v54  ;;  %v1868_v46 = vld [vmem:[#allocation5 + $0x118] sm:$0xff]  ;;  %v1867_v54 = vld [vmem:[#allocation5 + $0x110] sm:$0xff] }
 0x153   :  { %1759 = vmatpush2.bf16.msra.mxu1 %v2618_v53  ;;  %1688 = vmatmul.mubr.bf16.vlgmr.msra.gmra.mxu0 %v2989_v23  ;;  %v1859_v23 = vld [vmem:[#allocation5 + $0xd0] sm:$0xff] }
 0x154   :  { %1697 = vmatprep.mubr.bf16.mxu0 %v3018_v43  ;;  %2310 = vmatpush3.msra.mxu0 %v1848_v15  ;;  %v1843_v43 = vld [vmem:[#allocation5 + $0x50] sm:$0xff]  ;;  %v1882_v15 = vld [vmem:[#allocation5 + $0x188] sm:$0xff] }
 0x155   :  { %2311 = vmatprep.subr.mxu0 %v1863_v17  ;;  %2365 = vmatprep.subr.mxu1 %v1896_v58  ;;  %v1883_v53 = vld [vmem:[#allocation5 + $0x190] sm:$0xff]  ;;  %v1866_v17 = vld [vmem:[#allocation5 + $0x108] sm:$0xff] }
 0x156   :  { %1761 = vmatmul.mubr.bf16.vlgmr.msra.gmra.mxu1 %v2991_v24  ;;  %2312 = vmatpush3.msra.mxu0 %v1847_v2  ;;  %v1858_v24 = vld [vmem:[#allocation5 + $0xc8] sm:$0xff]  ;;  %v1881_v2 = vld [vmem:[#allocation5 + $0x180] sm:$0xff] }
 0x157   :  { %1770 = vmatprep.mubr.bf16.mxu1 %v3020_v44  ;;  %2313 = vmatprep.subr.mxu0 %v1862_v5  ;;  %v1842_v44 = vld [vmem:[#allocation5 + $0x48] sm:$0xff]  ;;  %v1865_v5 = vld [vmem:[#allocation5 + $0x100] sm:$0xff] }
 0x158   :  { %2314 = vmatpush3.msra.mxu0 %v1846_v8  ;;  %2366 = vmatpush3.msra.mxu1 %v1880_v59  ;;  %v3098_v8 = vld [vmem:[%s3167_s6] sm:$0xf] }
 0x159   :  { %2315 = vmatprep.subr.mxu0 %v1861_v37  ;;  %2367 = vmatprep.subr.mxu1 %v1895_v42  ;;  %v3103_v37 = vrot.slane %v3098_v8, %v621_v1 }
 0x15a   :  { %2316 = vmatpush3.msra.mxu0 %v1845_v38  ;;  %v3108_v38 = vrot.slane %v3098_v8, %v625_v4 }
 0x15b   :  { %1698 = vmatmul.mubr.bf16.gmra.mxu0 %v3023_v50  ;;  %2317 = vmatprep.subr.mxu0 %v1860_v11  ;;  %v1840_v50 = vld [vmem:[#allocation5 + $0x38] sm:$0xff] }
 0x15c   :  { %1707 = vmatprep.mubr.bf16.mxu0 %v3048_v56  ;;  %2318 = vmatpush3.msra.mxu0 %v1844_v12  ;;  %v1839_v56 = vld [vmem:[#allocation5 + $0x30] sm:$0xff] }
 0x15d   :  { %2319 = vmatprep.subr.mxu0 %v1859_v23 }
 0x15e   :  { %1771 = vmatmul.mubr.bf16.gmra.mxu1 %v3025_v51  ;;  %2320 = vmatpush3.msra.mxu0 %v1843_v43  ;;  %v1854_v51 = vld [vmem:[#allocation5 + $0xa8] sm:$0xff] }
 0x15f   :  { %1780 = vmatprep.mubr.bf16.mxu1 %v3056_v31  ;;  %2321 = vmatprep.subr.mxu0 %v1858_v24  ;;  %v1838_v31 = vld [vmem:[#allocation5 + $0x28] sm:$0xff] }
 0x160   :  { %2322 = vmatpush3.msra.mxu0 %v1842_v44 }
 0x161   :  { %2323 = vmatprep.subr.mxu0 %v1857_v16 }
 0x162   :  { %2324 = vmatpush3.msra.mxu0 %v1841_v18 }
 0x163   :  { %1708 = vmatmul.mubr.bf16.gmra.mxu0 %v3044_v26  ;;  %2325 = vmatprep.subr.mxu0 %v1856_v19  ;;  %v1836_v26 = vld [vmem:[#allocation5 + $0x18] sm:$0xff] }
 0x164   :  { %1717 = vmatprep.mubr.bf16.mxu0 %v3067_v6  ;;  %2326 = vmatpush3.msra.mxu0 %v1840_v50  ;;  %v1835_v6 = vld [vmem:[#allocation5 + $0x10] sm:$0xff] }
 0x165   :  { %2327 = vmatprep.subr.mxu0 %v1855_v21 }
 0x166   :  { %1781 = vmatmul.mubr.bf16.gmra.mxu1 %v3062_v0  ;;  %2328 = vmatpush3.msra.mxu0 %v1839_v56  ;;  %v1850_v0 = vld [vmem:[#allocation5 + $0x88] sm:$0xff] }
 0x167   :  { %1790 = vmatprep.mubr.bf16.mxu1 %v3069_v13  ;;  %2329 = vmatprep.subr.mxu0 %v1854_v51  ;;  %v1834_v13 = vld [vmem:[#allocation5 + $0x8] sm:$0xff] }
 0x168   :  { %2330 = vmatpush3.msra.mxu0 %v1838_v31 }
 0x169   :  { %2331 = vmatprep.subr.mxu0 %v1853_v39 }
 0x16a   :  { %2332 = vmatpush3.msra.mxu0 %v1837_v20 }
 0x16b   :  { %1718 = vmatmul.mubr.bf16.gmra.mxu0 %v3073_v10  ;;  %2333 = vmatprep.subr.mxu0 %v1852_v47  ;;  %v1879_v10 = vld [vmem:[#allocation5 + $0x170] sm:$0xff] }
 0x16c   :  { %2334 = vmatpush3.msra.mxu0 %v1836_v26  ;;  %2368 = vmatpush3.msra.mxu1 %v1879_v10 }
 0x16d   :  { %2335 = vmatprep.subr.mxu0 %v1851_v25  ;;  %2369 = vmatprep.subr.mxu1 %v1894_v41 }
 0x16e   :  { %1791 = vmatmul.mubr.bf16.gmra.mxu1 %v3076_v14  ;;  %2336 = vmatpush3.msra.mxu0 %v1835_v6  ;;  %v1893_v14 = vld [vmem:[#allocation5 + $0x1e0] sm:$0xff] }
 0x16f   :  { %2337 = vmatprep.subr.mxu0 %v1850_v0  ;;  %2370 = vmatpush3.msra.mxu1 %v1878_v27 }
 0x170   :  { %2338 = vmatpush3.msra.mxu0 %v1834_v13  ;;  %2371 = vmatprep.subr.mxu1 %v1893_v14 }
 0x171   :  { %2339 = vmatprep.subr.mxu0 %v1849_v22  ;;  %2372 = vmatpush3.msra.mxu1 %v1877_v28 }
 0x172   :  { %2340 = vmatpush3.msra.mxu0 %v1833_v40  ;;  %2373 = vmatprep.subr.mxu1 %v1892_v29 }
 0x173   :  { %2374 = vmatpush3.msra.mxu1 %v1876_v49 }
 0x174   :  { %2375 = vmatprep.subr.mxu1 %v1891_v30 }
 0x175   :  { %2376 = vmatpush3.msra.mxu1 %v1875_v57 }
 0x176   :  { %2377 = vmatprep.subr.mxu1 %v1890_v48 }
 0x177   :  { %2378 = vmatpush3.msra.mxu1 %v1874_v52 }
 0x178   :  { %2379 = vmatprep.subr.mxu1 %v1889_v61 }
 0x179   :  { %2380 = vmatpush3.msra.mxu1 %v1873_v62 }
 0x17a   :  { %2381 = vmatprep.subr.mxu1 %v1888_v32 }
 0x17b   :  { %2382 = vmatpush3.msra.mxu1 %v1872_v33 }
 0x17c   :  { %2383 = vmatprep.subr.mxu1 %v1887_v34 }
 0x17d   :  { %2384 = vmatpush3.msra.mxu1 %v1871_v63 }
 0x17e   :  { %2385 = vmatprep.subr.mxu1 %v1886_v35 }
 0x17f   :  { %2386 = vmatpush3.msra.mxu1 %v1870_v36 }
 0x180   :  { %2387 = vmatprep.subr.mxu1 %v1885_v55 }
 0x181   :  { %2388 = vmatpush3.msra.mxu1 %v1869_v9 }
 0x182   :  { %2389 = vmatprep.subr.mxu1 %v1884_v45 }
 0x183   :  { %2390 = vmatpush3.msra.mxu1 %v1868_v46 }
 0x184   :  { %2391 = vmatprep.subr.mxu1 %v1883_v53 }
 0x185   :  { %2392 = vmatpush3.msra.mxu1 %v1867_v54 }
 0x186   :  { %2393 = vmatprep.subr.mxu1 %v1882_v15 }
 0x187   :  { %2394 = vmatpush3.msra.mxu1 %v1866_v17 }
 0x188   :  { %2395 = vmatprep.subr.mxu1 %v1881_v2 }
 0x189   :  { %2396 = vmatpush3.msra.mxu1 %v1865_v5 }
 0x1d3   :  { %v1543_v11 = vpop.f32.mrf.mxu0 }
 0x1d4   :  { %v1616_v12 = vpop.f32.mrf.mxu1  ;;  %v1544_v23 = vadd.f32 %v1543_v11, %v3103_v37 }
 0x1d5   :  { %v1545_v43 = vpop.f32.mrf.mxu0 }
 0x1d6   :  { %v1618_v24 = vpop.f32.mrf.mxu1  ;;  %v1546_v44 = vadd.f32 %v1545_v43, %v3108_v38  ;;  %v1617_v16 = vadd.f32 %v1616_v12, %v1544_v23 }
 0x1d7   :  { %v1547_v18 = vpop.f32.mrf.mxu0 }
 0x1d8   :  { %v1620_v19 = vpop.f32.mrf.mxu1  ;;  %v1619_v50 = vadd.f32 %v1618_v24, %v1546_v44  ;;  %v1548_v1 = vadd.f32 %v1547_v18, %v3103_v37  ;;  %v1801_v31 = vmax.f32 %v1617_v16, 0.0 }
 0x1d9   :  { %v1549_v21 = vpop.f32.mrf.mxu0 }
 0x1da   :  { %v1622_v56 = vpop.f32.mrf.mxu1  ;;  %v1802_v51 = vmax.f32 %v1619_v50, 0.0  ;;  %v1550_v4 = vadd.f32 %v1549_v21, %v3108_v38  ;;  %v1621_v39 = vadd.f32 %v1620_v19, %v1548_v1 }
 0x1db   :  { %v1553_v20 = vpop.f32.mrf.mxu0 }
 0x1dc   :  { %v1626_v47 = vpop.f32.mrf.mxu1  ;;  %v1623_v26 = vadd.f32 %v1622_v56, %v1550_v4  ;;  %v1554_v25 = vadd.f32 %v1553_v20, %v3103_v37  ;;  %1968 = vmatprep.mubr.f32.mxu0 %v1802_v51  ;;  %v1805_v40 = vmax.f32 %v1621_v39, 0.0 }
 0x1dd   :  { %v1555_v6 = vpop.f32.mrf.mxu0  ;;  %1969 = vmatmul.mubr.f32.vlgmr.msra.gmra.mxu0 %v1801_v31 }
 0x1de   :  { %v1628_v0 = vpop.f32.mrf.mxu1  ;;  %v1806_v13 = vmax.f32 %v1623_v26, 0.0  ;;  %v1556_v22 = vadd.f32 %v1555_v6, %v3108_v38  ;;  %v1627_v58 = vadd.f32 %v1626_v47, %v1554_v25 }
 0x1df   :  { %v1557_v59 = vpop.f32.mrf.mxu0 }
 0x1e0   :  { %v1630_v42 = vpop.f32.mrf.mxu1  ;;  %v1629_v10 = vadd.f32 %v1628_v0, %v1556_v22  ;;  %v1558_v41 = vadd.f32 %v1557_v59, %v3103_v37  ;;  %1973 = vmatprep.mubr.f32.mxu0 %v1806_v13  ;;  %v1809_v49 = vmax.f32 %v1627_v58, 0.0  ;;  %v3134_v0 = vrot.slane %v3098_v8, %v633_v7 }
 0x1e1   :  { %v1559_v27 = vpop.f32.mrf.mxu0  ;;  %1974 = vmatmul.mubr.f32.gmra.mxu0 %v1805_v40 }
 0x1e2   :  { %v1632_v14 = vpop.f32.mrf.mxu1  ;;  %v1810_v28 = vmax.f32 %v1629_v10, 0.0  ;;  %v1560_v29 = vadd.f32 %v1559_v27, %v3108_v38  ;;  %v1631_v30 = vadd.f32 %v1630_v42, %v1558_v41 }
 0x1e3   :  { %v1563_v57 = vpop.f32.mrf.mxu0 }
 0x1e4   :  { %v1633_v48 = vadd.f32 %v1632_v14, %v1560_v29  ;;  %v1564_v52 = vadd.f32 %v1563_v57, %v3103_v37  ;;  %1978 = vmatprep.mubr.f32.mxu0 %v1810_v28  ;;  %v1813_v34 = vmax.f32 %v1631_v30, 0.0 }
 0x1e5   :  { %v1636_v61 = vpop.f32.mrf.mxu1  ;;  %v1565_v62 = vpop.f32.mrf.mxu0  ;;  %1979 = vmatmul.mubr.f32.gmra.mxu0 %v1809_v49 }
 0x1e6   :  { %v1814_v32 = vmax.f32 %v1633_v48, 0.0  ;;  %v1566_v33 = vadd.f32 %v1565_v62, %v3108_v38  ;;  %v1637_v63 = vadd.f32 %v1636_v61, %v1564_v52 }
 0x1e7   :  { %v1638_v35 = vpop.f32.mrf.mxu1  ;;  %v1567_v36 = vpop.f32.mrf.mxu0 }
 0x1e8   :  { %v1639_v55 = vadd.f32 %v1638_v35, %v1566_v33  ;;  %v1568_v9 = vadd.f32 %v1567_v36, %v3103_v37  ;;  %1983 = vmatprep.mubr.f32.mxu0 %v1814_v32  ;;  %v1817_v15 = vmax.f32 %v1637_v63, 0.0 }
 0x1e9   :  { %v1640_v45 = vpop.f32.mrf.mxu1  ;;  %v1569_v46 = vpop.f32.mrf.mxu0  ;;  %1984 = vmatmul.mubr.f32.gmra.mxu0 %v1813_v34 }
 0x1ea   :  { %v1818_v53 = vmax.f32 %v1639_v55, 0.0  ;;  %v1570_v54 = vadd.f32 %v1569_v46, %v3108_v38  ;;  %v1641_v17 = vadd.f32 %v1640_v45, %v1568_v9 }
 0x1eb   :  { %v1642_v2 = vpop.f32.mrf.mxu1  ;;  %v1573_v5 = vpop.f32.mrf.mxu0 }
 0x1ec   :  { %v1643_v11 = vadd.f32 %v1642_v2, %v1570_v54  ;;  %v1574_v12 = vadd.f32 %v1573_v5, %v3103_v37  ;;  %1988 = vmatprep.mubr.f32.mxu0 %v1818_v53  ;;  %v1821_v16 = vmax.f32 %v1641_v17, 0.0 }
 0x1ed   :  { %v1646_v23 = vpop.f32.mrf.mxu1  ;;  %v1575_v43 = vpop.f32.mrf.mxu0  ;;  %1989 = vmatmul.mubr.f32.gmra.mxu0 %v1817_v15 }
 0x1ee   :  { %v1822_v24 = vmax.f32 %v1643_v11, 0.0  ;;  %v1576_v44 = vadd.f32 %v1575_v43, %v3108_v38  ;;  %v1647_v18 = vadd.f32 %v1646_v23, %v1574_v12 }
 0x1ef   :  { %v1648_v19 = vpop.f32.mrf.mxu1  ;;  %v1577_v50 = vpop.f32.mrf.mxu0 }
 0x1f0   :  { %v1649_v1 = vadd.f32 %v1648_v19, %v1576_v44  ;;  %v1578_v21 = vadd.f32 %v1577_v50, %v3103_v37  ;;  %1993 = vmatprep.mubr.f32.mxu0 %v1822_v24  ;;  %v1825_v39 = vmax.f32 %v1647_v18, 0.0  ;;  %v3129_v37 = vrot.slane %v3098_v8, %v629_v3 }
 0x1f1   :  { %v1650_v56 = vpop.f32.mrf.mxu1  ;;  %v1579_v51 = vpop.f32.mrf.mxu0  ;;  %1994 = vmatmul.mubr.f32.gmra.mxu0 %v1821_v16 }
 0x1f2   :  { %v1826_v4 = vmax.f32 %v1649_v1, 0.0  ;;  %v1580_v31 = vadd.f32 %v1579_v51, %v3108_v38  ;;  %v1651_v20 = vadd.f32 %v1650_v56, %v1578_v21 }
 0x1f3   :  { %v1652_v47 = vpop.f32.mrf.mxu1 }
 0x1f4   :  { %v1653_v26 = vadd.f32 %v1652_v47, %v1580_v31  ;;  %1998 = vmatprep.mubr.f32.mxu0 %v1826_v4  ;;  %v1829_v6 = vmax.f32 %v1651_v20, 0.0 }
 0x1f5   :  { %1999 = vmatmul.mubr.f32.gmra.mxu0 %v1825_v39 }
 0x1f6   :  { %v1830_v25 = vmax.f32 %v1653_v26, 0.0 }
 0x1f8   :  { %2003 = vmatprep.mubr.f32.mxu0 %v1830_v25 }
 0x1f9   :  { %2004 = vmatmul.mubr.f32.gmra.mxu0 %v1829_v6 }
 0x213   :  { %v1689_v38 = vpop.f32.mrf.mxu0 }
 0x214   :  { %v1690_v13 = vadd.f32 %v1689_v38, %v3129_v37 }
 0x215   :  { %v1691_v40 = vpop.f32.mrf.mxu0 }
 0x216   :  { %v1762_v22 = vpop.f32.mrf.mxu1  ;;  %v1692_v58 = vadd.f32 %v1691_v40, %v3134_v0 }
 0x217   :  { %v1763_v59 = vadd.f32 %v1762_v22, %v1690_v13  ;;  %v1693_v10 = vpop.f32.mrf.mxu0 }
 0x218   :  { %v1764_v42 = vpop.f32.mrf.mxu1  ;;  %v1694_v27 = vadd.f32 %v1693_v10, %v3129_v37 }
 0x219   :  { %v1765_v41 = vadd.f32 %v1764_v42, %v1692_v58  ;;  %v1695_v14 = vpop.f32.mrf.mxu0  ;;  %v1803_v7 = vmax.f32 %v1763_v59, 0.0 }
 0x21a   :  { %v1766_v3 = vpop.f32.mrf.mxu1  ;;  %v1696_v60 = vadd.f32 %v1695_v14, %v3134_v0 }
 0x21b   :  { %v1804_v28 = vmax.f32 %v1765_v41, 0.0  ;;  %v1767_v8 = vadd.f32 %v1766_v3, %v1694_v27  ;;  %v1699_v49 = vpop.f32.mrf.mxu0 }
 0x21c   :  { %v1768_v29 = vpop.f32.mrf.mxu1  ;;  %v1700_v57 = vadd.f32 %v1699_v49, %v3129_v37 }
 0x21d   :  { %v1769_v30 = vadd.f32 %v1768_v29, %v1696_v60  ;;  %2073 = vmatprep.mubr.f32.mxu1 %v1804_v28  ;;  %v1701_v52 = vpop.f32.mrf.mxu0  ;;  %v1807_v32 = vmax.f32 %v1767_v8, 0.0 }
 0x21e   :  { %v1772_v48 = vpop.f32.mrf.mxu1  ;;  %2074 = vmatmul.mubr.f32.vlgmr.msra.gmra.mxu1 %v1803_v7  ;;  %v1702_v62 = vadd.f32 %v1701_v52, %v3134_v0 }
 0x21f   :  { %v1808_v61 = vmax.f32 %v1769_v30, 0.0  ;;  %v1773_v33 = vadd.f32 %v1772_v48, %v1700_v57  ;;  %v1703_v63 = vpop.f32.mrf.mxu0 }
 0x220   :  { %v1774_v34 = vpop.f32.mrf.mxu1  ;;  %v1704_v36 = vadd.f32 %v1703_v63, %v3129_v37 }
 0x221   :  { %v1775_v35 = vadd.f32 %v1774_v34, %v1702_v62  ;;  %2078 = vmatprep.mubr.f32.mxu1 %v1808_v61  ;;  %v1705_v9 = vpop.f32.mrf.mxu0  ;;  %v1811_v53 = vmax.f32 %v1773_v33, 0.0  ;;  %v2308_v34 = vld [vmem:[%s3169_s8] ss:$0 sm:$0xff]  ;;  %s2694_s8 = smov [#allocation7]  }
 0x222   :  { %v1776_v55 = vpop.f32.mrf.mxu1  ;;  %2079 = vmatmul.mubr.f32.gmra.mxu1 %v1807_v32  ;;  %v1706_v46 = vadd.f32 %v1705_v9, %v3134_v0  ;;  %s2127_s12 = sshll.u32 %s2694_s8, 4  ;;  %s2128_s12 = int_to_ptr.vmem [resolvable:$true] %s2127_s12 }
 0x223   :  { %v1812_v45 = vmax.f32 %v1775_v35, 0.0  ;;  %v1777_v54 = vadd.f32 %v1776_v55, %v1704_v36  ;;  %v1709_v17 = vpop.f32.mrf.mxu0  ;;  %s2661_s13 = scalar_lea.vmem %s2128_s12, 1024  ;;  %p2666_p11 = scmp.lt.s32.totalorder %s2128_s12, %s2128_s12 }
 0x224   :  { %v1778_v15 = vpop.f32.mrf.mxu1  ;;  %v1710_v5 = vadd.f32 %v1709_v17, %v3129_v37  ;;  %p2662_p10 = scmp.ne.s32.totalorder %s2128_s12, %s2661_s13  ;;  %p2667_p12 = scmp.lt.s32.totalorder %s2661_s13, %s2661_s13 }
 0x225   :  { %v1779_v2 = vadd.f32 %v1778_v15, %v1706_v46  ;;  %2083 = vmatprep.mubr.f32.mxu1 %v1812_v45  ;;  %v1711_v12 = vpop.f32.mrf.mxu0  ;;  %v1815_v24 = vmax.f32 %v1777_v54, 0.0 }
 0x226   :  { %v1782_v11 = vpop.f32.mrf.mxu1  ;;  %2084 = vmatmul.mubr.f32.gmra.mxu1 %v1811_v53  ;;  %v1712_v43 = vadd.f32 %v1711_v12, %v3134_v0  ;;  %p2668_p13 = por %p2667_p12, %p2666_p11 }
 0x227   :  { %v1816_v23 = vmax.f32 %v1779_v2, 0.0  ;;  %v1783_v44 = vadd.f32 %v1782_v11, %v1710_v5  ;;  %v1713_v18 = vpop.f32.mrf.mxu0 }
 0x228   :  { %v1784_v16 = vpop.f32.mrf.mxu1  ;;  %v1714_v50 = vadd.f32 %v1713_v18, %v3129_v37  ;;  %p2669_p0 = pnand %p2668_p13, %p2662_p10 }
 0x229   :  { %v1785_v19 = vadd.f32 %v1784_v16, %v1712_v43  ;;  %2088 = vmatprep.mubr.f32.mxu1 %v1816_v23  ;;  %v1715_v21 = vpop.f32.mrf.mxu0  ;;  %v1819_v4 = vmax.f32 %v1783_v44, 0.0 }
 0x22a   :  { %v1786_v1 = vpop.f32.mrf.mxu1  ;;  %2089 = vmatmul.mubr.f32.gmra.mxu1 %v1815_v24  ;;  %v1716_v51 = vadd.f32 %v1715_v21, %v3134_v0 }
 0x22b   :  { %v1820_v56 = vmax.f32 %v1785_v19, 0.0  ;;  %v1787_v31 = vadd.f32 %v1786_v1, %v1714_v50  ;;  %v1719_v20 = vpop.f32.mrf.mxu0 }
 0x22c   :  { %v1788_v39 = vpop.f32.mrf.mxu1  ;;  %v1720_v26 = vadd.f32 %v1719_v20, %v3129_v37 }
 0x22d   :  { %v1789_v47 = vadd.f32 %v1788_v39, %v1716_v51  ;;  %2093 = vmatprep.mubr.f32.mxu1 %v1820_v56  ;;  %v1721_v6 = vpop.f32.mrf.mxu0  ;;  %v1823_v22 = vmax.f32 %v1787_v31, 0.0 }
 0x22e   :  { %v1792_v25 = vpop.f32.mrf.mxu1  ;;  %2094 = vmatmul.mubr.f32.gmra.mxu1 %v1819_v4  ;;  %v1722_v13 = vadd.f32 %v1721_v6, %v3134_v0 }
 0x22f   :  { %v1824_v38 = vmax.f32 %v1789_v47, 0.0  ;;  %v1793_v40 = vadd.f32 %v1792_v25, %v1720_v26  ;;  %v1723_v59 = vpop.f32.mrf.mxu0 }
 0x230   :  { %v1794_v58 = vpop.f32.mrf.mxu1  ;;  %v1724_v10 = vadd.f32 %v1723_v59, %v3129_v37 }
 0x231   :  { %v1795_v42 = vadd.f32 %v1794_v58, %v1722_v13  ;;  %2098 = vmatprep.mubr.f32.mxu1 %v1824_v38  ;;  %v1725_v27 = vpop.f32.mrf.mxu0  ;;  %v1827_v28 = vmax.f32 %v1793_v40, 0.0 }
 0x232   :  { %v1796_v41 = vpop.f32.mrf.mxu1  ;;  %2099 = vmatmul.mubr.f32.gmra.mxu1 %v1823_v22  ;;  %v1726_v14 = vadd.f32 %v1725_v27, %v3134_v0 }
 0x233   :  { %v1828_v3 = vmax.f32 %v1795_v42, 0.0  ;;  %v1797_v60 = vadd.f32 %v1796_v41, %v1724_v10 }
 0x234   :  { %v1798_v7 = vpop.f32.mrf.mxu1 }
 0x235   :  { %v1799_v8 = vadd.f32 %v1798_v7, %v1726_v14  ;;  %2103 = vmatprep.mubr.f32.mxu1 %v1828_v3  ;;  %v1831_v49 = vmax.f32 %v1797_v60, 0.0 }
 0x236   :  { %2104 = vmatmul.mubr.f32.gmra.mxu1 %v1827_v28 }
 0x237   :  { %v1832_v29 = vmax.f32 %v1799_v8, 0.0 }
 0x239   :  { %2108 = vmatprep.mubr.f32.mxu1 %v1832_v29 }
 0x23a   :  { %2109 = vmatmul.mubr.f32.gmra.mxu1 %v1831_v49 }
 0x29d   :  { %v2341_v30 = vpop.f32.mrf.mxu0 }
 0x29f   :  { %v2342_v57 = vpop.f32.mrf.mxu0 }
 0x2a0   :  { %v2343_v0 = vadd.f32 %v2342_v57, %v2341_v30 }
 0x2a1   :  { %v2344_v37 = vpop.f32.mrf.mxu0 }
 0x2a2   :  { %v1971_v55 = vadd.f32 %v2343_v0, %v2308_v34 }
 0x2a3   :  { %v2345_v48 = vpop.f32.mrf.mxu0 }
 0x2a4   :  { %v2346_v9 = vadd.f32 %v2345_v48, %v2344_v37 }
 0x2a5   :  { %v2347_v52 = vpop.f32.mrf.mxu0 }
 0x2a6   :  { %v1976_v17 = vadd.f32 %v2346_v9, %v2308_v34 }
 0x2a7   :  { %v2348_v61 = vpop.f32.mrf.mxu0 }
 0x2a8   :  { %v2349_v2 = vadd.f32 %v2348_v61, %v2347_v52 }
 0x2a9   :  { %v2350_v62 = vpop.f32.mrf.mxu0 }
 0x2aa   :  { %v1981_v24 = vadd.f32 %v2349_v2, %v2308_v34 }
 0x2ab   :  { %v2351_v32 = vpop.f32.mrf.mxu0 }
 0x2ac   :  { %v2352_v44 = vadd.f32 %v2351_v32, %v2350_v62 }
 0x2ad   :  { %v2353_v33 = vpop.f32.mrf.mxu0 }
 0x2ae   :  { %v1986_v21 = vadd.f32 %v2352_v44, %v2308_v34 }
 0x2af   :  { %v2354_v63 = vpop.f32.mrf.mxu0 }
 0x2b0   :  { %v2355_v56 = vadd.f32 %v2354_v63, %v2353_v33 }
 0x2b1   :  { %v2356_v46 = vpop.f32.mrf.mxu0 }
 0x2b2   :  { %v1991_v47 = vadd.f32 %v2355_v56, %v2308_v34 }
 0x2b3   :  { %v2357_v11 = vpop.f32.mrf.mxu0 }
 0x2b4   :  { %v2358_v26 = vadd.f32 %v2357_v11, %v2356_v46 }
 0x2b5   :  { %v2359_v18 = vpop.f32.mrf.mxu0 }
 0x2b6   :  { %v1996_v40 = vadd.f32 %v2358_v26, %v2308_v34 }
 0x2b7   :  { %v2360_v4 = vpop.f32.mrf.mxu0 }
 0x2b8   :  { %v2361_v58 = vadd.f32 %v2360_v4, %v2359_v18 }
 0x2b9   :  { %v2362_v6 = vpop.f32.mrf.mxu0 }
 0x2ba   :  { %v2001_v3 = vadd.f32 %v2361_v58, %v2308_v34 }
 0x2bb   :  { %v2363_v42 = vpop.f32.mrf.mxu0 }
 0x2bc   :  { %v2364_v14 = vadd.f32 %v2363_v42, %v2362_v6 }
 0x2be   :  { %v2006_v29 = vadd.f32 %v2364_v14, %v2308_v34 }
 0x2de   :  { %v2397_v35 = vpop.f32.mrf.mxu1 }
 0x2e0   :  { %v2398_v36 = vpop.f32.mrf.mxu1 }
 0x2e1   :  { %v2399_v45 = vadd.f32 %v2398_v36, %v2397_v35 }
 0x2e2   :  { %v2400_v53 = vpop.f32.mrf.mxu1 }
 0x2e3   :  { %v2076_v54 = vadd.f32 %v2399_v45, %v1971_v55 }
 0x2e4   :  { %v2401_v15 = vpop.f32.mrf.mxu1 }
 0x2e5   :  { %2114 = vst [vmem:[#allocation7] sm:$0xff] %v2076_v54  ;;  %v2402_v5 = vadd.f32 %v2401_v15, %v2400_v53 }
 0x2e6   :  { %v2403_v12 = vpop.f32.mrf.mxu1 }
 0x2e7   :  { %v2081_v23 = vadd.f32 %v2402_v5, %v1976_v17 }
 0x2e8   :  { %v2404_v43 = vpop.f32.mrf.mxu1 }
 0x2e9   :  { %2115 = vst [vmem:[#allocation7 + $0x8] sm:$0xff] %v2081_v23  ;;  %v2405_v16 = vadd.f32 %v2404_v43, %v2403_v12 }
 0x2ea   :  { %v2406_v19 = vpop.f32.mrf.mxu1 }
 0x2eb   :  { %v2086_v50 = vadd.f32 %v2405_v16, %v1981_v24 }
 0x2ec   :  { %v2407_v1 = vpop.f32.mrf.mxu1 }
 0x2ed   :  { %2116 = vst [vmem:[#allocation7 + $0x10] sm:$0xff] %v2086_v50  ;;  %v2408_v51 = vadd.f32 %v2407_v1, %v2406_v19 }
 0x2ee   :  { %v2409_v31 = vpop.f32.mrf.mxu1 }
 0x2ef   :  { %v2091_v39 = vadd.f32 %v2408_v51, %v1986_v21 }
 0x2f0   :  { %v2410_v20 = vpop.f32.mrf.mxu1 }
 0x2f1   :  { %2117 = vst [vmem:[#allocation7 + $0x18] sm:$0xff] %v2091_v39  ;;  %v2411_v25 = vadd.f32 %v2410_v20, %v2409_v31 }
 0x2f2   :  { %v2412_v38 = vpop.f32.mrf.mxu1 }
 0x2f3   :  { %v2096_v13 = vadd.f32 %v2411_v25, %v1991_v47 }
 0x2f4   :  { %v2413_v22 = vpop.f32.mrf.mxu1 }
 0x2f5   :  { %2118 = vst [vmem:[#allocation7 + $0x20] sm:$0xff] %v2096_v13  ;;  %v2414_v59 = vadd.f32 %v2413_v22, %v2412_v38 }
 0x2f6   :  { %v2415_v10 = vpop.f32.mrf.mxu1 }
 0x2f7   :  { %v2101_v41 = vadd.f32 %v2414_v59, %v1996_v40 }
 0x2f8   :  { %v2416_v27 = vpop.f32.mrf.mxu1 }
 0x2f9   :  { %2119 = vst [vmem:[#allocation7 + $0x28] sm:$0xff] %v2101_v41  ;;  %v2417_v28 = vadd.f32 %v2416_v27, %v2415_v10 }
 0x2fa   :  { %v2418_v60 = vpop.f32.mrf.mxu1 }
 0x2fb   :  { %v2106_v7 = vadd.f32 %v2417_v28, %v2001_v3 }
 0x2fc   :  { %v2419_v8 = vpop.f32.mrf.mxu1 }
 0x2fd   :  { %2120 = vst [vmem:[#allocation7 + $0x30] sm:$0xff] %v2106_v7  ;;  %v2420_v49 = vadd.f32 %v2419_v8, %v2418_v60 }
 0x2ff   :  { %v2111_v30 = vadd.f32 %v2420_v49, %v2006_v29 }
 0x301   :  { %2121 = vst [vmem:[#allocation7 + $0x38] sm:$0xff] %v2111_v30 }
 0x302   :  { %2672 = shalt.err (!%p2669_p0)
}
 0x303   :  { %2133 = dma.vmem_to_hbm [thread:$0]  %s2128_s12, 1024, %s3170_s9, [#allocation4], %s2691_s19, %s2691_s19, %s2692_s20  }
 0x304   :  { %2685 = dma.done.wait [#allocation4], 1024  }
 0x305   :  { %2686 = vsyncadd [#allocation4], 4294966272 }
 0x306   :  { %2137 = vsyncpa [#allocation3], 1 }
 0x307   :  { %2138 = vsyncpa [#allocation6], 1 }
 0x308   :  { %2139 = vsyncpa [#allocation4], 1 }

</bundles_post_ra>
